<compile_context>
chip_gen: v7x
topology: tpu7x:2x2x1
jax: 0.10.0
libtpu: 0.0.40
codegen_flags: <defaults>
</compile_context>

<pallas_src>
import functools

import jax
import jax.numpy as jnp
from jax.experimental import pallas as pl
from jax.experimental.pallas import tpu as pltpu

_HI = jax.lax.Precision.HIGHEST


# ----------------------------------------------------------------------------
# The single fused kernel:
#   dense chain  h = act(h @ W_i + b_i)   (MLP + folded up-conv stages)
#   + structured final 1x1 conv (per-pixel block-diagonal) + optional sigmoid.
# ----------------------------------------------------------------------------
def _decoder_kernel(x_ref, *refs, dense_acts, hw, c_in, c_out, final_sigmoid):
    n = len(dense_acts)
    w_refs = refs[:n]
    b_refs = refs[n:2 * n]
    w11_ref = refs[2 * n]          # SMEM (c_in + 1, c_out) f32: rows 0..c_in-1 weights, last row bias
    o_ref = refs[2 * n + 1]

    # --- dense chain: MLP layers + folded (ConvT 2x2 s2 -> Conv3x3 -> ReLU) ---
    h = x_ref[:, 0, :]                                     # (bt, K0) f32
    for i in range(n):
        w = w_refs[i][...]                                 # (K, N) bf16
        y = jnp.dot(h.astype(w.dtype), w,
                    preferred_element_type=jnp.float32)    # f32 MXU accumulation
        y = y + b_refs[i][...]                             # (1, N) f32 bias
        if dense_acts[i] == "relu":
            y = jnp.maximum(y, 0.0)
        h = y                                              # ends as (bt, c_in*hw) NCHW-flat

    # --- final 1x1 conv: block-diagonal per pixel, applied on the VPU with
    # exact f32 SMEM scalar weights (no dense (c_in*hw, c_out*hw) operator). ---
    for o in range(c_out):
        acc = h[:, 0:hw] * w11_ref[0, o]
        for c in range(1, c_in):
            acc = acc + h[:, c * hw:(c + 1) * hw] * w11_ref[c, o]
        acc = acc + w11_ref[c_in, o]                       # bias
        if final_sigmoid:
            acc = jax.nn.sigmoid(acc)
        o_ref[:, 0, o * hw:(o + 1) * hw] = acc             # 256-lane dense store


def conv_decoder_apply(x, weights, biases, w11, *, dense_acts, img_shape,
                       final_sigmoid, num_batch_tiles=None):
    """x: (B, z_dim); weights[i]: (K_i, N_i) bf16; biases[i]: (1, N_i) f32;
    w11: (C_last+1, C_out) f32 (1x1 conv weights + bias row).
    Returns (B, C, H, W) f32 (NCHW, matching the PyTorch module)."""
    B, k0 = x.shape
    C, H, W = img_shape
    hw = H * W
    c_in = int(w11.shape[0]) - 1
    d_out = C * hw
    assert int(weights[-1].shape[1]) == c_in * hw

    if num_batch_tiles is None:
        # Weight-DMA / overhead bound at small B: keep the whole batch in ONE
        # grid step.  Only split across the (megacore-parallel) grid once the
        # per-core matmul work can amortize its own copy of the operators.
        num_batch_tiles = 2 if (B >= 128 and B % 2 == 0) else 1
    assert B % num_batch_tiles == 0, (B, num_batch_tiles)
    bt = B // num_batch_tiles

    # Batch kept as a leading dim (B, 1, K) so every block's minor-two dims
    # equal the full array dims (clean (8,128)-rule compliance).
    x3 = x.astype(jnp.float32).reshape(B, 1, k0)

    in_specs = [pl.BlockSpec((bt, 1, k0), lambda i: (i, 0, 0))]
    in_specs += [pl.BlockSpec(w.shape, lambda i: (0, 0)) for w in weights]
    in_specs += [pl.BlockSpec(b.shape, lambda i: (0, 0)) for b in biases]
    in_specs += [pl.BlockSpec(memory_space=pltpu.MemorySpace.SMEM)]   # w11 scalars

    flops = 2 * B * sum(int(w.shape[0]) * int(w.shape[1]) for w in weights)
    flops += 2 * B * c_in * C * hw
    transcendentals = B * d_out if final_sigmoid else 0
    bytes_accessed = int(
        x3.size * 4 + B * d_out * 4 + w11.size * 4
        + sum(int(w.size) * w.dtype.itemsize for w in weights)
        + sum(int(b.size) * b.dtype.itemsize for b in biases))

    out = pl.pallas_call(
        functools.partial(_decoder_kernel, dense_acts=tuple(dense_acts),
                          hw=hw, c_in=c_in, c_out=C,
                          final_sigmoid=bool(final_sigmoid)),
        grid=(num_batch_tiles,),
        in_specs=in_specs,
        out_specs=pl.BlockSpec((bt, 1, d_out), lambda i: (i, 0, 0)),
        out_shape=jax.ShapeDtypeStruct((B, 1, d_out), jnp.float32),
        compiler_params=pltpu.CompilerParams(
            dimension_semantics=("parallel",)),
        cost_estimate=pl.CostEstimate(flops=int(flops),
                                      transcendentals=int(transcendentals),
                                      bytes_accessed=bytes_accessed),
    )(x3, *weights, *biases, w11)
    return out.reshape(B, C, H, W)


# ----------------------------------------------------------------------------
# Init-time weight preprocessing (run once, outside the jitted forward):
# fold each UpConvBlock / LastConv up-stage into one affine operator on the
# NCHW-flattened feature map; keep the final 1x1 conv in structured form.
# ----------------------------------------------------------------------------
def _convT_2x2_s2_nchw(x, wt, bt):
    """ConvTranspose2d(k=2, s=2).  x: (N,Cin,h,w); wt: (Cin,Cout,2,2) torch layout."""
    n, _, h, w = x.shape
    cout = wt.shape[1]
    y = jnp.einsum("ncij,code->noidje", x, wt, precision=_HI)
    y = y.reshape(n, cout, 2 * h, 2 * w)
    return y + bt[None, :, None, None]


def _conv_nchw(x, wc, bc, pad):
    """Conv2d (cross-correlation, torch OIHW weights)."""
    y = jax.lax.conv_general_dilated(
        x, wc, window_strides=(1, 1), padding=((pad, pad), (pad, pad)),
        dimension_numbers=("NCHW", "OIHW", "NCHW"), precision=_HI)
    return y + bc[None, :, None, None]


def _linearize(fn_batch, in_dim):
    """Exact (A, beta) with fn(x) == x @ A + beta for an affine fn (no relu)."""
    basis = jnp.concatenate(
        [jnp.zeros((1, in_dim), jnp.float32), jnp.eye(in_dim, dtype=jnp.float32)],
        axis=0)
    out = fn_batch(basis)
    beta = out[0]
    return out[1:] - beta[None, :], beta


def build_fused_params(params, *, H, W, channel_list, input_channel, sigmoid,
                       op_dtype=jnp.bfloat16):
    """One-time weight re-layout for the fused decoder kernel."""
    factor = 2 ** len(channel_list)
    weights, biases, acts = [], [], []

    # MLP: LinearBlock (relu) for all but the last plain Linear.  Weights are
    # pre-transposed to (K, N) and stored bf16 (uniform bf16 MXU chain).
    mlp = params["mlp"]
    for i, layer in enumerate(mlp):
        weights.append(jnp.asarray(layer["w"], jnp.float32).T.astype(op_dtype))
        biases.append(jnp.asarray(layer["b"], jnp.float32).reshape(1, -1))
        acts.append("relu" if i < len(mlp) - 1 else "none")

    # UpConvBlocks + the UpConvBlock inside LastConv: each ConvT(2,2,s2)+Conv3x3
    # pair (no nonlinearity between them in the reference module) becomes one
    # affine operator on the NCHW-flat feature vector.
    chans = list(channel_list)
    h, w = H // factor, W // factor
    stages = [(params["blocks"][i - 1], chans[i - 1]) for i in range(1, len(chans))]
    stages.append((params["last"], chans[-1]))
    for bp, cin in stages:
        in_dim = cin * h * w

        def fn_batch(xf, bp=bp, cin=cin, h=h, w=w):
            xi = xf.reshape(xf.shape[0], cin, h, w)
            y = _convT_2x2_s2_nchw(xi, bp["up_w"], bp["up_b"])
            y = _conv_nchw(y, bp["conv_w"], bp["conv_b"], pad=1)
            return y.reshape(xf.shape[0], -1)

        a_op, beta = _linearize(fn_batch, in_dim)
        weights.append(a_op.astype(op_dtype))
        biases.append(beta.reshape(1, -1).astype(jnp.float32))
        acts.append("relu")
        h, w = 2 * h, 2 * w

    # Final 1x1 conv: structured per-pixel form (exact f32 scalars for SMEM),
    # NOT densified — removes the single largest operator from HBM traffic.
    last = params["last"]
    cl = chans[-1]
    w2 = jnp.asarray(last["conv2_w"], jnp.float32).reshape(input_channel, cl)
    b2 = jnp.asarray(last["conv2_b"], jnp.float32)
    w11 = jnp.concatenate([w2.T, b2.reshape(1, -1)], axis=0)     # (cl+1, C_out)

    return {"weights": weights, "biases": biases, "dense_acts": tuple(acts),
            "w11": w11, "img_shape": (input_channel, H, W),
            "final_sigmoid": bool(sigmoid)}


# ----------------------------------------------------------------------------
# Deterministic parameter init (PyTorch weight layouts)
# ----------------------------------------------------------------------------
def init_params(key, z_dim, hidden_dims, channel_list, input_channel, H, W):
    factor = 2 ** len(channel_list)
    fc_size = channel_list[0] * (H // factor) * (W // factor)
    mlp_dims = [z_dim] + list(hidden_dims) + [fc_size]

    keys = iter(jax.random.split(key, 64))

    def nrm(shape, scale=0.1):
        return scale * jax.random.normal(next(keys), shape, dtype=jnp.float32)

    params = {"mlp": [], "blocks": []}
    for i in range(1, len(mlp_dims)):
        params["mlp"].append({"w": nrm((mlp_dims[i], mlp_dims[i - 1])),
                              "b": nrm((mlp_dims[i],))})
    chans = list(channel_list)
    for i in range(1, len(chans)):
        cin, cout = chans[i - 1], chans[i]
        params["blocks"].append({
            "up_w": nrm((cin, cin, 2, 2)), "up_b": nrm((cin,)),
            "conv_w": nrm((cout, cin, 3, 3)), "conv_b": nrm((cout,)),
        })
    cl = chans[-1]
    params["last"] = {
        "up_w": nrm((cl, cl, 2, 2)), "up_b": nrm((cl,)),
        "conv_w": nrm((cl, cl, 3, 3)), "conv_b": nrm((cl,)),
        "conv2_w": nrm((input_channel, cl, 1, 1)), "conv2_b": nrm((input_channel,)),
    }
    return params


# ----------------------------------------------------------------------------
# Pure-JAX reference (correctness check only)
# ----------------------------------------------------------------------------
def reference_forward(x, params, *, H, W, channel_list, sigmoid):
    factor = 2 ** len(channel_list)
    c0 = channel_list[0]
    b = x.shape[0]
    h = x
    mlp = params["mlp"]
    for i, layer in enumerate(mlp):
        h = jnp.dot(h, layer["w"].T, precision=_HI) + layer["b"]
        if i < len(mlp) - 1:
            h = jnp.maximum(h, 0.0)
    h = h.reshape(b, c0, H // factor, W // factor)
    for bp in list(params["blocks"]) + [params["last"]]:
        h = _convT_2x2_s2_nchw(h, bp["up_w"], bp["up_b"])
        h = jnp.maximum(_conv_nchw(h, bp["conv_w"], bp["conv_b"], pad=1), 0.0)
    last = params["last"]
    h = _conv_nchw(h, last["conv2_w"], last["conv2_b"], pad=0)
    if sigmoid:
        h = jax.nn.sigmoid(h)
    return h


if __name__ == "__main__":
    # Small, self-consistent ConvDecoder config:
    #   H=W=16, channel_list=[8,4] -> factor=4, fc_size = 8*4*4 = 128
    #   mlp dims: [8, 32, 128]
    H, W = 16, 16
    input_channel = 3
    channel_list = [8, 4]
    hidden_dims = [32]
    z_dim = 8
    sigmoid = True
    B = 2

    key = jax.random.PRNGKey(0)
    pkey, xkey = jax.random.split(key)
    params = init_params(pkey, z_dim, hidden_dims, channel_list, input_channel, H, W)
    x = jax.random.normal(xkey, (B, z_dim), dtype=jnp.float32)

    # One-time weight preprocessing (model-load-time re-layout).
    fused = build_fused_params(params, H=H, W=W, channel_list=channel_list,
                               input_channel=input_channel, sigmoid=sigmoid)

    fwd = jax.jit(functools.partial(conv_decoder_apply,
                                    dense_acts=fused["dense_acts"],
                                    img_shape=fused["img_shape"],
                                    final_sigmoid=fused["final_sigmoid"]))
    out = jax.block_until_ready(
        fwd(x, fused["weights"], fused["biases"], fused["w11"]))
    assert out.shape == (B, input_channel, H, W), out.shape

    ref = jax.block_until_ready(
        reference_forward(x, params, H=H, W=W, channel_list=channel_list,
                          sigmoid=sigmoid))
    err = float(jnp.max(jnp.abs(out - ref)))
    if err > 2e-2:
        raise AssertionError(f"Pallas output mismatch vs reference, max abs err = {err}")

    print("KERNEL_OK")
</pallas_src>

<mosaic_0001>
module attributes {stable_mosaic.version = 11 : i64} {
  func.func @_decoder_kernel(%arg0: i32, %arg1: memref<2x1x8xf32, #tpu.memory_space<vmem>>, %arg2: memref<8x32xbf16, #tpu.memory_space<vmem>>, %arg3: memref<32x128xbf16, #tpu.memory_space<vmem>>, %arg4: memref<128x256xbf16, #tpu.memory_space<vmem>>, %arg5: memref<256x1024xbf16, #tpu.memory_space<vmem>>, %arg6: memref<1x32xf32, #tpu.memory_space<vmem>>, %arg7: memref<1x128xf32, #tpu.memory_space<vmem>>, %arg8: memref<1x256xf32, #tpu.memory_space<vmem>>, %arg9: memref<1x1024xf32, #tpu.memory_space<vmem>>, %arg10: memref<5x3xf32, #tpu.memory_space<smem>>, %arg11: memref<2x1x768xf32, #tpu.memory_space<vmem>>) attributes {dimension_semantics = [#tpu.dimension_semantics<parallel>], iteration_bounds = array<i64: 1>, scalar_prefetch = 0 : i64, scratch_operands = 0 : i64, tpu.core_type = #tpu.core_type<tc>, window_params = [{transform_indices = @transform_0, window_bounds = array<i64: 2, 1, 8>}, {pipeline_mode = #tpu.pipeline_mode<synchronous>, transform_indices = @transform_1, window_bounds = array<i64: 8, 32>}, {pipeline_mode = #tpu.pipeline_mode<synchronous>, transform_indices = @transform_2, window_bounds = array<i64: 32, 128>}, {pipeline_mode = #tpu.pipeline_mode<synchronous>, transform_indices = @transform_3, window_bounds = array<i64: 128, 256>}, {pipeline_mode = #tpu.pipeline_mode<synchronous>, transform_indices = @transform_4, window_bounds = array<i64: 256, 1024>}, {pipeline_mode = #tpu.pipeline_mode<synchronous>, transform_indices = @transform_5, window_bounds = array<i64: 1, 32>}, {pipeline_mode = #tpu.pipeline_mode<synchronous>, transform_indices = @transform_6, window_bounds = array<i64: 1, 128>}, {pipeline_mode = #tpu.pipeline_mode<synchronous>, transform_indices = @transform_7, window_bounds = array<i64: 1, 256>}, {pipeline_mode = #tpu.pipeline_mode<synchronous>, transform_indices = @transform_8, window_bounds = array<i64: 1, 1024>}, {transform_indices = @transform_9, window_bounds = array<i64: 5, 3>}, {transform_indices = @transform_10, window_bounds = array<i64: 2, 1, 768>}]} {
    %c0 = arith.constant 0 : index
    %c0_0 = arith.constant 0 : index
    %c0_1 = arith.constant 0 : index
    %0 = vector.load %arg1[%c0, %c0_0, %c0_1] : memref<2x1x8xf32, #tpu.memory_space<vmem>>, vector<2x1x8xf32>
    %1 = vector.shape_cast %0 : vector<2x1x8xf32> to vector<2x8xf32>
    %c0_2 = arith.constant 0 : index
    %c0_3 = arith.constant 0 : index
    %2 = vector.load %arg2[%c0_2, %c0_3] : memref<8x32xbf16, #tpu.memory_space<vmem>>, vector<8x32xbf16>
    %3 = arith.truncf %1 : vector<2x8xf32> to vector<2x8xbf16>
    %cst = arith.constant dense<0.000000e+00> : vector<2x32xf32>
    %4 = tpu.matmul %3, %2, %cst {dimension_numbers = #tpu.dot_dimension_numbers<[1], [0], [0], [1], [0, 0, 1, 1], [], []>} : vector<2x8xbf16>, vector<8x32xbf16>, vector<2x32xf32> -> vector<2x32xf32>
    %c0_4 = arith.constant 0 : index
    %c0_5 = arith.constant 0 : index
    %5 = vector.load %arg6[%c0_4, %c0_5] : memref<1x32xf32, #tpu.memory_space<vmem>>, vector<1x32xf32>
    %6 = vector.broadcast %5 : vector<1x32xf32> to vector<2x32xf32>
    %7 = arith.addf %4, %6 : vector<2x32xf32>
    %cst_6 = arith.constant 0.000000e+00 : f32
    %8 = vector.broadcast %cst_6 : f32 to vector<2x32xf32>
    %9 = arith.maximumf %7, %8 : vector<2x32xf32>
    %c0_7 = arith.constant 0 : index
    %c0_8 = arith.constant 0 : index
    %10 = vector.load %arg3[%c0_7, %c0_8] : memref<32x128xbf16, #tpu.memory_space<vmem>>, vector<32x128xbf16>
    %11 = arith.truncf %9 : vector<2x32xf32> to vector<2x32xbf16>
    %cst_9 = arith.constant dense<0.000000e+00> : vector<2x128xf32>
    %12 = tpu.matmul %11, %10, %cst_9 {dimension_numbers = #tpu.dot_dimension_numbers<[1], [0], [0], [1], [0, 0, 1, 1], [], []>} : vector<2x32xbf16>, vector<32x128xbf16>, vector<2x128xf32> -> vector<2x128xf32>
    %c0_10 = arith.constant 0 : index
    %c0_11 = arith.constant 0 : index
    %13 = vector.load %arg7[%c0_10, %c0_11] : memref<1x128xf32, #tpu.memory_space<vmem>>, vector<1x128xf32>
    %14 = vector.broadcast %13 : vector<1x128xf32> to vector<2x128xf32>
    %15 = arith.addf %12, %14 : vector<2x128xf32>
    %c0_12 = arith.constant 0 : index
    %c0_13 = arith.constant 0 : index
    %16 = vector.load %arg4[%c0_12, %c0_13] : memref<128x256xbf16, #tpu.memory_space<vmem>>, vector<128x256xbf16>
    %17 = arith.truncf %15 : vector<2x128xf32> to vector<2x128xbf16>
    %cst_14 = arith.constant dense<0.000000e+00> : vector<2x256xf32>
    %18 = tpu.matmul %17, %16, %cst_14 {dimension_numbers = #tpu.dot_dimension_numbers<[1], [0], [0], [1], [0, 0, 1, 1], [], []>} : vector<2x128xbf16>, vector<128x256xbf16>, vector<2x256xf32> -> vector<2x256xf32>
    %c0_15 = arith.constant 0 : index
    %c0_16 = arith.constant 0 : index
    %19 = vector.load %arg8[%c0_15, %c0_16] : memref<1x256xf32, #tpu.memory_space<vmem>>, vector<1x256xf32>
    %20 = vector.broadcast %19 : vector<1x256xf32> to vector<2x256xf32>
    %21 = arith.addf %18, %20 : vector<2x256xf32>
    %cst_17 = arith.constant 0.000000e+00 : f32
    %22 = vector.broadcast %cst_17 : f32 to vector<2x256xf32>
    %23 = arith.maximumf %21, %22 : vector<2x256xf32>
    %c0_18 = arith.constant 0 : index
    %c0_19 = arith.constant 0 : index
    %24 = vector.load %arg5[%c0_18, %c0_19] : memref<256x1024xbf16, #tpu.memory_space<vmem>>, vector<256x1024xbf16>
    %25 = arith.truncf %23 : vector<2x256xf32> to vector<2x256xbf16>
    %cst_20 = arith.constant dense<0.000000e+00> : vector<2x1024xf32>
    %26 = tpu.matmul %25, %24, %cst_20 {dimension_numbers = #tpu.dot_dimension_numbers<[1], [0], [0], [1], [0, 0, 1, 1], [], []>} : vector<2x256xbf16>, vector<256x1024xbf16>, vector<2x1024xf32> -> vector<2x1024xf32>
    %c0_21 = arith.constant 0 : index
    %c0_22 = arith.constant 0 : index
    %27 = vector.load %arg9[%c0_21, %c0_22] : memref<1x1024xf32, #tpu.memory_space<vmem>>, vector<1x1024xf32>
    %28 = vector.broadcast %27 : vector<1x1024xf32> to vector<2x1024xf32>
    %29 = arith.addf %26, %28 : vector<2x1024xf32>
    %cst_23 = arith.constant 0.000000e+00 : f32
    %30 = vector.broadcast %cst_23 : f32 to vector<2x1024xf32>
    %31 = arith.maximumf %29, %30 : vector<2x1024xf32>
    %32 = vector.extract_strided_slice %31 {offsets = [0, 0], sizes = [2, 256], strides = [1, 1]} : vector<2x1024xf32> to vector<2x256xf32>
    %c0_24 = arith.constant 0 : index
    %c0_25 = arith.constant 0 : index
    %33 = memref.load %arg10[%c0_24, %c0_25] : memref<5x3xf32, #tpu.memory_space<smem>>
    %34 = vector.broadcast %33 : f32 to vector<2x256xf32>
    %35 = arith.mulf %32, %34 : vector<2x256xf32>
    %36 = vector.extract_strided_slice %31 {offsets = [0, 256], sizes = [2, 256], strides = [1, 1]} : vector<2x1024xf32> to vector<2x256xf32>
    %c1 = arith.constant 1 : index
    %c0_26 = arith.constant 0 : index
    %37 = memref.load %arg10[%c1, %c0_26] : memref<5x3xf32, #tpu.memory_space<smem>>
    %38 = vector.broadcast %37 : f32 to vector<2x256xf32>
    %39 = arith.mulf %36, %38 : vector<2x256xf32>
    %40 = arith.addf %35, %39 : vector<2x256xf32>
    %41 = vector.extract_strided_slice %31 {offsets = [0, 512], sizes = [2, 256], strides = [1, 1]} : vector<2x1024xf32> to vector<2x256xf32>
    %c2 = arith.constant 2 : index
    %c0_27 = arith.constant 0 : index
    %42 = memref.load %arg10[%c2, %c0_27] : memref<5x3xf32, #tpu.memory_space<smem>>
    %43 = vector.broadcast %42 : f32 to vector<2x256xf32>
    %44 = arith.mulf %41, %43 : vector<2x256xf32>
    %45 = arith.addf %40, %44 : vector<2x256xf32>
    %46 = vector.extract_strided_slice %31 {offsets = [0, 768], sizes = [2, 256], strides = [1, 1]} : vector<2x1024xf32> to vector<2x256xf32>
    %c3 = arith.constant 3 : index
    %c0_28 = arith.constant 0 : index
    %47 = memref.load %arg10[%c3, %c0_28] : memref<5x3xf32, #tpu.memory_space<smem>>
    %48 = vector.broadcast %47 : f32 to vector<2x256xf32>
    %49 = arith.mulf %46, %48 : vector<2x256xf32>
    %50 = arith.addf %45, %49 : vector<2x256xf32>
    %c4 = arith.constant 4 : index
    %c0_29 = arith.constant 0 : index
    %51 = memref.load %arg10[%c4, %c0_29] : memref<5x3xf32, #tpu.memory_space<smem>>
    %52 = vector.broadcast %51 : f32 to vector<2x256xf32>
    %53 = arith.addf %50, %52 : vector<2x256xf32>
    %54 = arith.negf %53 : vector<2x256xf32>
    %55 = math.exp %54 : vector<2x256xf32>
    %cst_30 = arith.constant 1.000000e+00 : f32
    %56 = vector.broadcast %cst_30 : f32 to vector<2x256xf32>
    %57 = arith.addf %56, %55 : vector<2x256xf32>
    %58 = arith.divf %56, %57 : vector<2x256xf32>
    %c0_31 = arith.constant 0 : index
    %c0_32 = arith.constant 0 : index
    %c0_33 = arith.constant 0 : index
    %59 = vector.load %arg11[%c0_31, %c0_32, %c0_33] : memref<2x1x768xf32, #tpu.memory_space<vmem>>, vector<2x1x256xf32>
    %60 = vector.shape_cast %59 : vector<2x1x256xf32> to vector<2x256xf32>
    %61 = vector.shape_cast %58 : vector<2x256xf32> to vector<2x1x256xf32>
    tpu.vector_store %arg11[%c0_31, %c0_32, %c0_33], %61 {strides = array<i32>} : memref<2x1x768xf32, #tpu.memory_space<vmem>>, vector<2x1x256xf32>,
    %62 = vector.extract_strided_slice %31 {offsets = [0, 0], sizes = [2, 256], strides = [1, 1]} : vector<2x1024xf32> to vector<2x256xf32>
    %c0_34 = arith.constant 0 : index
    %c1_35 = arith.constant 1 : index
    %63 = memref.load %arg10[%c0_34, %c1_35] : memref<5x3xf32, #tpu.memory_space<smem>>
    %64 = vector.broadcast %63 : f32 to vector<2x256xf32>
    %65 = arith.mulf %62, %64 : vector<2x256xf32>
    %66 = vector.extract_strided_slice %31 {offsets = [0, 256], sizes = [2, 256], strides = [1, 1]} : vector<2x1024xf32> to vector<2x256xf32>
    %c1_36 = arith.constant 1 : index
    %c1_37 = arith.constant 1 : index
    %67 = memref.load %arg10[%c1_36, %c1_37] : memref<5x3xf32, #tpu.memory_space<smem>>
    %68 = vector.broadcast %67 : f32 to vector<2x256xf32>
    %69 = arith.mulf %66, %68 : vector<2x256xf32>
    %70 = arith.addf %65, %69 : vector<2x256xf32>
    %71 = vector.extract_strided_slice %31 {offsets = [0, 512], sizes = [2, 256], strides = [1, 1]} : vector<2x1024xf32> to vector<2x256xf32>
    %c2_38 = arith.constant 2 : index
    %c1_39 = arith.constant 1 : index
    %72 = memref.load %arg10[%c2_38, %c1_39] : memref<5x3xf32, #tpu.memory_space<smem>>
    %73 = vector.broadcast %72 : f32 to vector<2x256xf32>
    %74 = arith.mulf %71, %73 : vector<2x256xf32>
    %75 = arith.addf %70, %74 : vector<2x256xf32>
    %76 = vector.extract_strided_slice %31 {offsets = [0, 768], sizes = [2, 256], strides = [1, 1]} : vector<2x1024xf32> to vector<2x256xf32>
    %c3_40 = arith.constant 3 : index
    %c1_41 = arith.constant 1 : index
    %77 = memref.load %arg10[%c3_40, %c1_41] : memref<5x3xf32, #tpu.memory_space<smem>>
    %78 = vector.broadcast %77 : f32 to vector<2x256xf32>
    %79 = arith.mulf %76, %78 : vector<2x256xf32>
    %80 = arith.addf %75, %79 : vector<2x256xf32>
    %c4_42 = arith.constant 4 : index
    %c1_43 = arith.constant 1 : index
    %81 = memref.load %arg10[%c4_42, %c1_43] : memref<5x3xf32, #tpu.memory_space<smem>>
    %82 = vector.broadcast %81 : f32 to vector<2x256xf32>
    %83 = arith.addf %80, %82 : vector<2x256xf32>
    %84 = arith.negf %83 : vector<2x256xf32>
    %85 = math.exp %84 : vector<2x256xf32>
    %cst_44 = arith.constant 1.000000e+00 : f32
    %86 = vector.broadcast %cst_44 : f32 to vector<2x256xf32>
    %87 = arith.addf %86, %85 : vector<2x256xf32>
    %88 = arith.divf %86, %87 : vector<2x256xf32>
    %c0_45 = arith.constant 0 : index
    %c0_46 = arith.constant 0 : index
    %c256 = arith.constant 256 : index
    %89 = vector.load %arg11[%c0_45, %c0_46, %c256] : memref<2x1x768xf32, #tpu.memory_space<vmem>>, vector<2x1x256xf32>
    %90 = vector.shape_cast %89 : vector<2x1x256xf32> to vector<2x256xf32>
    %91 = vector.shape_cast %88 : vector<2x256xf32> to vector<2x1x256xf32>
    tpu.vector_store %arg11[%c0_45, %c0_46, %c256], %91 {strides = array<i32>} : memref<2x1x768xf32, #tpu.memory_space<vmem>>, vector<2x1x256xf32>,
    %92 = vector.extract_strided_slice %31 {offsets = [0, 0], sizes = [2, 256], strides = [1, 1]} : vector<2x1024xf32> to vector<2x256xf32>
    %c0_47 = arith.constant 0 : index
    %c2_48 = arith.constant 2 : index
    %93 = memref.load %arg10[%c0_47, %c2_48] : memref<5x3xf32, #tpu.memory_space<smem>>
    %94 = vector.broadcast %93 : f32 to vector<2x256xf32>
    %95 = arith.mulf %92, %94 : vector<2x256xf32>
    %96 = vector.extract_strided_slice %31 {offsets = [0, 256], sizes = [2, 256], strides = [1, 1]} : vector<2x1024xf32> to vector<2x256xf32>
    %c1_49 = arith.constant 1 : index
    %c2_50 = arith.constant 2 : index
    %97 = memref.load %arg10[%c1_49, %c2_50] : memref<5x3xf32, #tpu.memory_space<smem>>
    %98 = vector.broadcast %97 : f32 to vector<2x256xf32>
    %99 = arith.mulf %96, %98 : vector<2x256xf32>
    %100 = arith.addf %95, %99 : vector<2x256xf32>
    %101 = vector.extract_strided_slice %31 {offsets = [0, 512], sizes = [2, 256], strides = [1, 1]} : vector<2x1024xf32> to vector<2x256xf32>
    %c2_51 = arith.constant 2 : index
    %c2_52 = arith.constant 2 : index
    %102 = memref.load %arg10[%c2_51, %c2_52] : memref<5x3xf32, #tpu.memory_space<smem>>
    %103 = vector.broadcast %102 : f32 to vector<2x256xf32>
    %104 = arith.mulf %101, %103 : vector<2x256xf32>
    %105 = arith.addf %100, %104 : vector<2x256xf32>
    %106 = vector.extract_strided_slice %31 {offsets = [0, 768], sizes = [2, 256], strides = [1, 1]} : vector<2x1024xf32> to vector<2x256xf32>
    %c3_53 = arith.constant 3 : index
    %c2_54 = arith.constant 2 : index
    %107 = memref.load %arg10[%c3_53, %c2_54] : memref<5x3xf32, #tpu.memory_space<smem>>
    %108 = vector.broadcast %107 : f32 to vector<2x256xf32>
    %109 = arith.mulf %106, %108 : vector<2x256xf32>
    %110 = arith.addf %105, %109 : vector<2x256xf32>
    %c4_55 = arith.constant 4 : index
    %c2_56 = arith.constant 2 : index
    %111 = memref.load %arg10[%c4_55, %c2_56] : memref<5x3xf32, #tpu.memory_space<smem>>
    %112 = vector.broadcast %111 : f32 to vector<2x256xf32>
    %113 = arith.addf %110, %112 : vector<2x256xf32>
    %114 = arith.negf %113 : vector<2x256xf32>
    %115 = math.exp %114 : vector<2x256xf32>
    %cst_57 = arith.constant 1.000000e+00 : f32
    %116 = vector.broadcast %cst_57 : f32 to vector<2x256xf32>
    %117 = arith.addf %116, %115 : vector<2x256xf32>
    %118 = arith.divf %116, %117 : vector<2x256xf32>
    %c0_58 = arith.constant 0 : index
    %c0_59 = arith.constant 0 : index
    %c512 = arith.constant 512 : index
    %119 = vector.load %arg11[%c0_58, %c0_59, %c512] : memref<2x1x768xf32, #tpu.memory_space<vmem>>, vector<2x1x256xf32>
    %120 = vector.shape_cast %119 : vector<2x1x256xf32> to vector<2x256xf32>
    %121 = vector.shape_cast %118 : vector<2x256xf32> to vector<2x1x256xf32>
    tpu.vector_store %arg11[%c0_58, %c0_59, %c512], %121 {strides = array<i32>} : memref<2x1x768xf32, #tpu.memory_space<vmem>>, vector<2x1x256xf32>,
    return
  }
  func.func @transform_0(%arg0: i32) -> (i32, i32, i32) {
    %c0_i32 = arith.constant 0 : i32
    %c0_i32_0 = arith.constant 0 : i32
    %c0_i32_1 = arith.constant 0 : i32
    return %arg0, %c0_i32, %c0_i32_0 : i32, i32, i32
  }
  func.func @transform_1(%arg0: i32) -> (i32, i32) {
    %c0_i32 = arith.constant 0 : i32
    %c0_i32_0 = arith.constant 0 : i32
    %c0_i32_1 = arith.constant 0 : i32
    return %c0_i32, %c0_i32_0 : i32, i32
  }
  func.func @transform_2(%arg0: i32) -> (i32, i32) {
    %c0_i32 = arith.constant 0 : i32
    %c0_i32_0 = arith.constant 0 : i32
    %c0_i32_1 = arith.constant 0 : i32
    return %c0_i32, %c0_i32_0 : i32, i32
  }
  func.func @transform_3(%arg0: i32) -> (i32, i32) {
    %c0_i32 = arith.constant 0 : i32
    %c0_i32_0 = arith.constant 0 : i32
    %c0_i32_1 = arith.constant 0 : i32
    return %c0_i32, %c0_i32_0 : i32, i32
  }
  func.func @transform_4(%arg0: i32) -> (i32, i32) {
    %c0_i32 = arith.constant 0 : i32
    %c0_i32_0 = arith.constant 0 : i32
    %c0_i32_1 = arith.constant 0 : i32
    return %c0_i32, %c0_i32_0 : i32, i32
  }
  func.func @transform_5(%arg0: i32) -> (i32, i32) {
    %c0_i32 = arith.constant 0 : i32
    %c0_i32_0 = arith.constant 0 : i32
    %c0_i32_1 = arith.constant 0 : i32
    return %c0_i32, %c0_i32_0 : i32, i32
  }
  func.func @transform_6(%arg0: i32) -> (i32, i32) {
    %c0_i32 = arith.constant 0 : i32
    %c0_i32_0 = arith.constant 0 : i32
    %c0_i32_1 = arith.constant 0 : i32
    return %c0_i32, %c0_i32_0 : i32, i32
  }
  func.func @transform_7(%arg0: i32) -> (i32, i32) {
    %c0_i32 = arith.constant 0 : i32
    %c0_i32_0 = arith.constant 0 : i32
    %c0_i32_1 = arith.constant 0 : i32
    return %c0_i32, %c0_i32_0 : i32, i32
  }
  func.func @transform_8(%arg0: i32) -> (i32, i32) {
    %c0_i32 = arith.constant 0 : i32
    %c0_i32_0 = arith.constant 0 : i32
    %c0_i32_1 = arith.constant 0 : i32
    return %c0_i32, %c0_i32_0 : i32, i32
  }
  func.func @transform_9(%arg0: i32) -> (i32, i32) {
    %c0_i32 = arith.constant 0 : i32
    %c0_i32_0 = arith.constant 0 : i32
    %c0_i32_1 = arith.constant 0 : i32
    return %c0_i32, %c0_i32_0 : i32, i32
  }
  func.func @transform_10(%arg0: i32) -> (i32, i32, i32) {
    %c0_i32 = arith.constant 0 : i32
    %c0_i32_0 = arith.constant 0 : i32
    %c0_i32_1 = arith.constant 0 : i32
    return %arg0, %c0_i32, %c0_i32_0 : i32, i32, i32
  }
}

</mosaic_0001>

<bundles_post_ra>
// kernel: conv_decoder_apply.1
= control target key start
LH: loop header
LB: loop body
LE: loop exit
PB: predicated region body
PF: predicated region fallthrough
CT: control target
= control target key end

     0   :  { %15 = vsyncpa [#allocation3], 0  ;;  %s2167_s0 = inlined_call_operand.vmem [shape: f32[2,1,8], index: 0, kind: input, shape index: {}]   ;;  %s2168_s1 = inlined_call_operand.hbm [shape: bf16[8,32], index: 1, kind: input, shape index: {}]   ;;  %s2169_s2 = inlined_call_operand.vmem [shape: bf16[32,128], index: 2, kind: input, shape index: {}]   ;;  %s2170_s3 = inlined_call_operand.hbm [shape: bf16[128,256], index: 3, kind: input, shape index: {}]   ;;  %s2171_s4 = inlined_call_operand.hbm [shape: bf16[256,1024], index: 4, kind: input, shape index: {}]   ;;  %s2172_s5 = inlined_call_operand.vmem [shape: f32[1,32], index: 5, kind: input, shape index: {}]   ;;  %s2173_s6 = inlined_call_operand.vmem [shape: f32[1,128], index: 6, kind: input, shape index: {}]   ;;  %s2174_s7 = inlined_call_operand.vmem [shape: f32[1,256], index: 7, kind: input, shape index: {}]   ;;  %s2175_s8 = inlined_call_operand.vmem [shape: f32[1,1024], index: 8, kind: input, shape index: {}]   ;;  %s2176_s9 = inlined_call_operand.vmem [shape: f32[5,3], index: 9, kind: input, shape index: {}]   ;;  %s2177_s10 = inlined_call_operand.vmem [shape: f32[2,1,768], index: 10, kind: output, shape index: {}]  }
   0x1   :  { %16 = vsyncpa [#allocation6], 0 }
   0x2   :  { %17 = vsyncpa [#allocation4], 0  ;;  %s1908_s13 = smov [#allocation5]   ;;  %s1824_s17 = scalar_lea.hbm %s2170_s3, 2048 }
   0x3   :  { %s37_s14 = sshll.u32 %s1908_s13, 4  ;;  %p1825_p0 = scmp.ne.s32.totalorder %s2170_s3, %s1824_s17  ;;  %s38_s14 = int_to_ptr.vmem [resolvable:$true] %s37_s14 }
   0x4   :  { %p1828_p1 = scmp.lt.u32.totalorder %s1824_s17, %s2170_s3 }
   0x6   :  { %p1830_p2 = pnand %p1828_p1, %p1825_p0 }
   0x8   :  { %1833 = shalt.err (!%p1830_p2)
}
   0x9   :  { %s1834_s22 = scalar_lea.vmem %s38_s14, 2048  ;;  %p1839_p4 = scmp.lt.s32.totalorder %s38_s14, %s38_s14 }
   0xa   :  { %p1835_p3 = scmp.ne.s32.totalorder %s38_s14, %s1834_s22  ;;  %p1840_p5 = scmp.lt.s32.totalorder %s1834_s22, %s1834_s22 }
   0xc   :  { %p1841_p6 = por %p1840_p5, %p1839_p4 }
   0xe   :  { %p1842_p7 = pnand %p1841_p6, %p1835_p3 }
  0x10   :  { %1845 = shalt.err (!%p1842_p7)
}
  0x11   :  { %s1909_s23 = smov 128   ;;  %s1910_s24 = smov 8  }
  0x12   :  { %43 = dma.hbm_to_vmem [thread:$0]  %s2170_s3, 2048, %s38_s14, [#allocation6], %s1909_s23, %s1909_s23, %s1910_s24  }
  0x13   :  { %s1911_s27 = smov [#allocation2]   ;;  %s1912_s29 = smov [#allocation7]  }
  0x14   :  { %s26_s28 = sshll.u32 %s1911_s27, 4  ;;  %s49_s30 = sshll.u32 %s1912_s29, 4  ;;  %s27_s28 = int_to_ptr.vmem [resolvable:$true] %s26_s28  ;;  %s50_s30 = int_to_ptr.vmem [resolvable:$true] %s49_s30 }
  0x15   :  { %s1846_s13 = scalar_lea.hbm %s2168_s1, 64 }
  0x16   :  { %p1847_p8 = scmp.ne.s32.totalorder %s2168_s1, %s1846_s13  ;;  %p1850_p9 = scmp.lt.u32.totalorder %s1846_s13, %s2168_s1 }
  0x18   :  { %p1852_p10 = pnand %p1850_p9, %p1847_p8 }
  0x1a   :  { %1855 = shalt.err (!%p1852_p10)
}
  0x1b   :  { %s1856_s3 = scalar_lea.vmem %s27_s28, 64  ;;  %p1861_p12 = scmp.lt.s32.totalorder %s27_s28, %s27_s28 }
  0x1c   :  { %p1857_p11 = scmp.ne.s32.totalorder %s27_s28, %s1856_s3  ;;  %p1862_p13 = scmp.lt.s32.totalorder %s1856_s3, %s1856_s3 }
  0x1e   :  { %p1863_p0 = por %p1862_p13, %p1861_p12 }
  0x20   :  { %p1864_p1 = pnand %p1863_p0, %p1857_p11 }
  0x22   :  { %1867 = shalt.err (!%p1864_p1)
}
  0x23   :  { %29 = dma.hbm_to_vmem [thread:$0]  %s2168_s1, 64, %s27_s28, [#allocation3]  }
  0x24   :  { %s70_s22 = sshll.u32 %s2176_s9, 4  ;;  %s1868_s25 = scalar_lea.hbm %s2171_s4, 16384  ;;  %s71_s22 = int_to_ptr.vmem [resolvable:$true] %s70_s22 }
  0x25   :  { %p1869_p2 = scmp.ne.s32.totalorder %s2171_s4, %s1868_s25  ;;  %p1872_p3 = scmp.lt.u32.totalorder %s1868_s25, %s2171_s4 }
  0x27   :  { %p1874_p4 = pnand %p1872_p3, %p1869_p2 }
  0x29   :  { %1877 = shalt.err (!%p1874_p4)
}
  0x2a   :  { %s1878_s1 = scalar_lea.vmem %s50_s30, 16384  ;;  %p1883_p6 = scmp.lt.s32.totalorder %s50_s30, %s50_s30 }
  0x2b   :  { %p1879_p5 = scmp.ne.s32.totalorder %s50_s30, %s1878_s1  ;;  %p1884_p7 = scmp.lt.s32.totalorder %s1878_s1, %s1878_s1 }
  0x2d   :  { %p1885_p8 = por %p1884_p7, %p1883_p6 }
  0x2f   :  { %p1886_p9 = pnand %p1885_p8, %p1879_p5 }
  0x31   :  { %1889 = shalt.err (!%p1886_p9)
}
  0x32   :  { %s1913_s9 = smov 512   ;;  %s1914_s28 = smov 32  }
  0x33   :  { %55 = dma.hbm_to_vmem [thread:$0]  %s2171_s4, 16384, %s50_s30, [#allocation6], %s1913_s9, %s1913_s9, %s1914_s28  }
  0x34   :  { %s1890_s15 = scalar_lea.vmem %s71_s22, 128  ;;  %p1895_p11 = scmp.lt.s32.totalorder %s71_s22, %s71_s22 }
  0x35   :  { %p1891_p10 = scmp.ne.s32.totalorder %s71_s22, %s1890_s15  ;;  %p1896_p12 = scmp.lt.s32.totalorder %s1890_s15, %s1890_s15 }
  0x37   :  { %p1897_p13 = por %p1896_p12, %p1895_p11 }
  0x39   :  { %p1898_p0 = pnand %p1897_p13, %p1891_p10 }
  0x3b   :  { %1901 = shalt.err (!%p1898_p0)
}
  0x3c   :  { %s1915_s16 = smov [#allocation8]  }
  0x3d   :  { %73 = dma.vmem_to_smem %s71_s22, 128, %s1915_s16, [#allocation4]  }
  0x3e   :  { %1902 = dma.done.wait [#allocation3], 64  }
  0x3f   :  { %1903 = vsyncadd [#allocation3], 4294967232 }
  0x40   :  { %1904 = dma.done.wait [#allocation6], 18432  }
  0x41   :  { %1905 = vsyncadd [#allocation6], 4294948864 }
  0x42   :  { %1906 = dma.done.wait [#allocation4], 128  }
  0x43   :  { %1907 = vsyncadd [#allocation4], 4294967168 }
  0x44   :  { %86 = sfence }
  0x45   :  { %v90_v0 = vld [vmem:[#allocation2] sm:$0xf]  ;;  %vm112_vm0 = vcmask 1043456   ;;  %v1916_v1 = vmov 0.0   ;;  %vm1917_vm1 = vmmov 0   ;;  %vm105_vm2 = vcmask 1041409  }
  0x46   :  { %1748 = vmatprep.subr.bf16.mxu1 %v1916_v1  ;;  %v114_v2 = vsel %vm112_vm0, %v90_v0, 0  ;;  %1750 = vmatprep.mubr.msk.bf16.mxu1 %vm1917_vm1, %v1916_v1  ;;  %v88_v3 = vld [vmem:[%s2167_s0] sm:$0x1]  ;;  %v89_v4 = vld [vmem:[%s2167_s0 + $0x1] sm:$0x1]  ;;  %vm108_vm3 = vcmask 64512  }
  0x47   :  { %1749 = vmatpush3.bf16.msra.mxu1 %v114_v2  ;;  %v91_v5 = vpack.c.bf16 %v88_v3, %v88_v3  ;;  %v92_v6 = vpack.c.bf16 %v89_v4, %v89_v4  ;;  %v1774_v10 = vld [vmem:[%s2169_s2] sm:$0xff]   ;;  %v1775_v13 = vld [vmem:[%s2169_s2 + $0x8] sm:$0xff]   ;;  %v1781_v17 = vld [vmem:[#allocation5 + $0x10] ss:$8 sps:$4 sm:$0xff]   ;;  %vm181_vm4 = vcmask 261120   ;;  %v1918_v38 = vmov 0  }
  0x48   :  { %1754 = vmatprep.subr.bf16.mxu1 %v1916_v1  ;;  %v1776_v14 = vld [vmem:[#allocation5 + $0x4] ss:$8 sps:$4 sm:$0xff]   ;;  %v1778_v15 = vld [vmem:[#allocation5] ss:$8 sps:$4 sm:$0xff]   ;;  %v1779_v16 = vld [vmem:[#allocation5 + $0x14] ss:$8 sps:$4 sm:$0xff]   ;;  %366 = vmatprep.mubr.bf16.mxu0 %v1918_v38 }
  0x49   :  { %v102_v7 = vunpack.c.l.b16 %v91_v5  ;;  %v103_v8 = vunpack.c.l.b16 %v92_v6  ;;  %334 = vmatprep.subr.bf16.mxu0 %v1776_v14  ;;  %v1782_v18 = vld [vmem:[#allocation5 + $0x24] ss:$8 sps:$4 sm:$0xff]   ;;  %v1784_v19 = vld [vmem:[#allocation5 + $0x20] ss:$8 sps:$4 sm:$0xff]   ;;  %v1785_v20 = vld [vmem:[#allocation5 + $0x34] ss:$8 sps:$4 sm:$0xff]  }
  0x4a   :  { %335 = vmatpush1.bf16.msra.mxu0 %v1778_v15  ;;  %v1787_v21 = vld [vmem:[#allocation5 + $0x30] ss:$8 sps:$4 sm:$0xff]   ;;  %v1788_v22 = vld [vmem:[#allocation5 + $0x44] ss:$8 sps:$4 sm:$0xff]   ;;  %v1790_v23 = vld [vmem:[#allocation5 + $0x40] ss:$8 sps:$4 sm:$0xff]  }
  0x4b   :  { %v104_v9 = vrot.slane %v103_v8, 7  ;;  %336 = vmatprep.subr.bf16.mxu0 %v1779_v16  ;;  %v1791_v24 = vld [vmem:[#allocation5 + $0x54] ss:$8 sps:$4 sm:$0xff]   ;;  %v1793_v25 = vld [vmem:[#allocation5 + $0x50] ss:$8 sps:$4 sm:$0xff]   ;;  %v377_v39 = vld [vmem:[#allocation7] sm:$0xff] }
  0x4c   :  { %v1794_v26 = vld [vmem:[#allocation5 + $0x64] ss:$8 sps:$4 sm:$0xff]   ;;  %v1796_v27 = vld [vmem:[#allocation5 + $0x60] ss:$8 sps:$4 sm:$0xff]   ;;  %v1573_v28 = vld [vmem:[%s2172_s5] ss:$0 sm:$0xff] }
  0x4d   :  { %v106_v11 = vsel %vm105_vm2, %v104_v9, %v102_v7  ;;  %v1797_v36 = vld [vmem:[#allocation5 + $0x74] ss:$8 sps:$4 sm:$0xff]   ;;  %v1799_v37 = vld [vmem:[#allocation5 + $0x70] ss:$8 sps:$4 sm:$0xff]   ;;  %v381_v40 = vld [vmem:[#allocation7 + $0x20] sm:$0xff]  ;;  %s2065_s23 = sld [smem:[#allocation8 + $0x1]] }
  0x4e   :  { %v107_v12 = vpack.c.b16 %v106_v11, %v106_v11  ;;  %337 = vmatpush1.bf16.msra.mxu0 %v1781_v17  ;;  %v2031_v41 = vld [vmem:[#allocation7 + $0x8] sm:$0xff]  ;;  %v1595_v42 = vcombine.low %v377_v39, %v381_v40  ;;  %v1596_v43 = vcombine.high %v377_v39, %v381_v40  ;;  %v385_v45 = vld [vmem:[#allocation7 + $0x40] sm:$0xff]  ;;  %s2073_s26 = sld [smem:[#allocation8 + $0x2]]  ;;  %s2075_s27 = sld [smem:[#allocation8 + $0x80]] }
  0x4f   :  { %338 = vmatprep.subr.bf16.mxu0 %v1782_v18  ;;  %v2033_v44 = vld [vmem:[#allocation7 + $0x28] sm:$0xff]  ;;  %v389_v46 = vld [vmem:[#allocation7 + $0x60] sm:$0xff]  ;;  %s2078_s29 = sld [smem:[#allocation8 + $0x81]]  ;;  %s2080_s11 = sld [smem:[#allocation8 + $0x82]] }
  0x50   :  { %1751 = vmatmul.mubr.msk.bf16.vlgmr.msra.gmra.mrb[0].mxu1 %vm108_vm3, %v107_v12  ;;  %v1597_v47 = vcombine.low %v2031_v41, %v2033_v44  ;;  %v1598_v48 = vcombine.high %v2031_v41, %v2033_v44  ;;  %v1604_v49 = vcombine.high %v385_v45, %v389_v46  ;;  %v1603_v50 = vcombine.low %v385_v45, %v389_v46  ;;  %v393_v51 = vld [vmem:[#allocation7 + $0x80] sm:$0xff]  ;;  %v390_v38 = vld [vmem:[#allocation7 + $0x68] sm:$0xff]  ;;  %s2099_s1 = sld [smem:[#allocation8 + $0x101]]  ;;  %s2101_s9 = sld [smem:[#allocation8 + $0x102]] }
  0x51   :  { %1755 = vmatpush3.bf16.msra.mxu1 %v1774_v10  ;;  %1758 = vmatprep.mubr.msk.bf16.mxu1 %vm1917_vm1, %v1916_v1  ;;  %v397_v52 = vld [vmem:[#allocation7 + $0xa0] sm:$0xff]  ;;  %s2104_s28 = sld [smem:[#allocation8 + $0x180]]  ;;  %s2106_s12 = sld [smem:[#allocation8 + $0x181]] }
  0x52   :  { %1756 = vmatprep.subr.bf16.mxu1 %v1916_v1  ;;  %339 = vmatpush1.bf16.msra.mxu0 %v1784_v19  ;;  %v1612_v53 = vcombine.high %v393_v51, %v397_v52  ;;  %v1611_v54 = vcombine.low %v393_v51, %v397_v52  ;;  %v401_v55 = vld [vmem:[#allocation7 + $0xc0] sm:$0xff]  ;;  %v402_v52 = vld [vmem:[#allocation7 + $0xc8] sm:$0xff]  ;;  %s2110_s13 = sld [smem:[#allocation8 + $0x200]]  ;;  %s2112_s15 = sld [smem:[#allocation8 + $0x182]] }
  0x53   :  { %340 = vmatprep.subr.bf16.mxu0 %v1785_v20  ;;  %v405_v56 = vld [vmem:[#allocation7 + $0xe0] sm:$0xff]  ;;  %s2114_s16 = sld [smem:[#allocation8 + $0x201]]  ;;  %s2116_s4 = sld [smem:[#allocation8 + $0x202]] }
  0x54   :  { %v1620_v57 = vcombine.high %v401_v55, %v405_v56  ;;  %v1619_v58 = vcombine.low %v401_v55, %v405_v56  ;;  %v409_v59 = vld [vmem:[#allocation7 + $0x100] sm:$0xff]  ;;  %v410_v56 = vld [vmem:[#allocation7 + $0x108] sm:$0xff] }
  0x55   :  { %1757 = vmatpush3.bf16.msra.mxu1 %v1775_v13  ;;  %v413_v60 = vld [vmem:[#allocation7 + $0x120] sm:$0xff] }
  0x56   :  { %341 = vmatpush1.bf16.msra.mxu0 %v1787_v21  ;;  %1189 = vmatprep.subr.bf16.mxu1 %v1596_v43  ;;  %v1628_v61 = vcombine.high %v409_v59, %v413_v60  ;;  %v1627_v62 = vcombine.low %v409_v59, %v413_v60  ;;  %v417_v63 = vld [vmem:[#allocation7 + $0x140] sm:$0xff]  ;;  %v418_v60 = vld [vmem:[#allocation7 + $0x148] sm:$0xff] }
  0x57   :  { %342 = vmatprep.subr.bf16.mxu0 %v1788_v22  ;;  %v421_v0 = vld [vmem:[#allocation7 + $0x160] sm:$0xff] }
  0x58   :  { %v1636_v1 = vcombine.high %v417_v63, %v421_v0  ;;  %v1635_v2 = vcombine.low %v417_v63, %v421_v0  ;;  %v425_v3 = vld [vmem:[#allocation7 + $0x180] sm:$0xff] }
  0x59   :  { %v429_v4 = vld [vmem:[#allocation7 + $0x1a0] sm:$0xff] }
  0x5a   :  { %343 = vmatpush1.bf16.msra.mxu0 %v1790_v23  ;;  %v1644_v5 = vcombine.high %v425_v3, %v429_v4  ;;  %v1643_v6 = vcombine.low %v425_v3, %v429_v4  ;;  %v433_v7 = vld [vmem:[#allocation7 + $0x1c0] sm:$0xff] }
  0x5b   :  { %344 = vmatprep.subr.bf16.mxu0 %v1791_v24  ;;  %v437_v8 = vld [vmem:[#allocation7 + $0x1e0] sm:$0xff] }
  0x5c   :  { %v1652_v9 = vcombine.high %v433_v7, %v437_v8  ;;  %v1651_v10 = vcombine.low %v433_v7, %v437_v8  ;;  %v441_v11 = vld [vmem:[#allocation7 + $0x200] sm:$0xff] }
  0x5d   :  { %v445_v12 = vld [vmem:[#allocation7 + $0x220] sm:$0xff] }
  0x5e   :  { %345 = vmatpush1.bf16.msra.mxu0 %v1793_v25  ;;  %v1660_v13 = vcombine.high %v441_v11, %v445_v12  ;;  %v1659_v14 = vcombine.low %v441_v11, %v445_v12  ;;  %v449_v15 = vld [vmem:[#allocation7 + $0x240] sm:$0xff] }
  0x5f   :  { %346 = vmatprep.subr.bf16.mxu0 %v1794_v26  ;;  %v453_v16 = vld [vmem:[#allocation7 + $0x260] sm:$0xff] }
  0x60   :  { %v1668_v17 = vcombine.high %v449_v15, %v453_v16  ;;  %v1667_v18 = vcombine.low %v449_v15, %v453_v16  ;;  %v457_v19 = vld [vmem:[#allocation7 + $0x280] sm:$0xff] }
  0x61   :  { %v461_v20 = vld [vmem:[#allocation7 + $0x2a0] sm:$0xff] }
  0x62   :  { %347 = vmatpush1.bf16.msra.mxu0 %v1796_v27  ;;  %v1676_v21 = vcombine.high %v457_v19, %v461_v20  ;;  %v1675_v22 = vcombine.low %v457_v19, %v461_v20  ;;  %v465_v23 = vld [vmem:[#allocation7 + $0x2c0] sm:$0xff] }
  0x63   :  { %348 = vmatprep.subr.bf16.mxu0 %v1797_v36  ;;  %v469_v24 = vld [vmem:[#allocation7 + $0x2e0] sm:$0xff] }
  0x64   :  { %v1684_v25 = vcombine.high %v465_v23, %v469_v24  ;;  %v1683_v26 = vcombine.low %v465_v23, %v469_v24  ;;  %v473_v27 = vld [vmem:[#allocation7 + $0x300] sm:$0xff] }
  0x66   :  { %349 = vmatpush1.bf16.msra.mxu0 %v1799_v37  ;;  %v386_v37 = vld [vmem:[#allocation7 + $0x48] sm:$0xff] }
  0x67   :  { %1230 = vmatprep.subr.bf16.mxu0 %v1598_v48  ;;  %v1606_v46 = vcombine.high %v386_v37, %v390_v38  ;;  %v394_v48 = vld [vmem:[#allocation7 + $0x88] sm:$0xff] }
 0x123   :  { %v150_v29 = vpop.f32.mrb[0].mxu1 }
 0x124   :  { %v151_v30 = vadd.f32 %v1573_v28, %v150_v29  ;;  %v1752_v31 = vpop.f32.mrb[1].mxu1  ;;  %v477_v28 = vld [vmem:[#allocation7 + $0x320] sm:$0xff] }
 0x125   :  { %v153_v32 = vpop.f32.mrb[2].mxu1  ;;  %v1692_v29 = vcombine.high %v473_v27, %v477_v28  ;;  %v481_v31 = vld [vmem:[#allocation7 + $0x340] sm:$0xff] }
 0x126   :  { %v156_v33 = vmax.f32 %v151_v30, 0.0  ;;  %v1753_v34 = vpop.f32.mrb[3].mxu1  ;;  %v1691_v30 = vcombine.low %v473_v27, %v477_v28  ;;  %v485_v32 = vld [vmem:[#allocation7 + $0x360] sm:$0xff] }
 0x127   :  { %v1699_v34 = vcombine.low %v481_v31, %v485_v32 }
 0x128   :  { %v161_v35 = vpack.c.bf16 %v156_v33, %v156_v33  ;;  %v1700_v33 = vcombine.high %v481_v31, %v485_v32  ;;  %v493_v31 = vld [vmem:[#allocation7 + $0x3a0] sm:$0xff]  ;;  %v490_v32 = vld [vmem:[#allocation7 + $0x388] sm:$0xff] }
 0x12a   :  { %1759 = vmatmul.mubr.msk.bf16.vlgmr.msra.gmra.mrb[4].mxu1 %vm181_vm4, %v161_v35  ;;  %v1575_v35 = vld [vmem:[%s2173_s6] ss:$0 sm:$0xff] }
 0x12b   :  { %1190 = vmatpush1.bf16.msra.mxu1 %v1595_v42 }
 0x12c   :  { %1191 = vmatprep.subr.bf16.mxu1 %v1604_v49  ;;  %v398_v49 = vld [vmem:[#allocation7 + $0xa8] sm:$0xff] }
 0x12d   :  { %v1614_v51 = vcombine.high %v394_v48, %v398_v49 }
 0x12f   :  { %1192 = vmatpush1.bf16.msra.mxu1 %v1603_v50  ;;  %v1605_v50 = vcombine.low %v386_v37, %v390_v38  ;;  %v497_v38 = vld [vmem:[#allocation7 + $0x3c0] sm:$0xff] }
 0x130   :  { %1193 = vmatprep.subr.bf16.mxu1 %v1612_v53  ;;  %v406_v53 = vld [vmem:[#allocation7 + $0xe8] sm:$0xff] }
 0x131   :  { %v1622_v55 = vcombine.high %v402_v52, %v406_v53 }
 0x133   :  { %1194 = vmatpush1.bf16.msra.mxu1 %v1611_v54  ;;  %v1613_v54 = vcombine.low %v394_v48, %v398_v49  ;;  %v379_v49 = vld [vmem:[#allocation7 + $0x10] sm:$0xff] }
 0x134   :  { %1195 = vmatprep.subr.bf16.mxu1 %v1620_v57  ;;  %v414_v57 = vld [vmem:[#allocation7 + $0x128] sm:$0xff] }
 0x135   :  { %v1630_v59 = vcombine.high %v410_v56, %v414_v57  ;;  %v1629_v41 = vcombine.low %v410_v56, %v414_v57  ;;  %v244_v57 = vlaneseq }
 0x137   :  { %1196 = vmatpush1.bf16.msra.mxu1 %v1619_v58  ;;  %v1621_v58 = vcombine.low %v402_v52, %v406_v53  ;;  %v384_v53 = vld [vmem:[#allocation7 + $0x38] sm:$0xff]  ;;  %vm2133_vm5 = vcmp.lt.s32.totalorder %v244_v57, 256 }
 0x138   :  { %1197 = vmatprep.subr.bf16.mxu1 %v1628_v61  ;;  %v422_v61 = vld [vmem:[#allocation7 + $0x168] sm:$0xff] }
 0x139   :  { %v1638_v44 = vcombine.high %v418_v60, %v422_v61  ;;  %v1637_v63 = vcombine.low %v418_v60, %v422_v61  ;;  %v242_v60 = vld [vmem:[%s2174_s7] sm:$0x3]  ;;  %s2063_s7 = sld [smem:[#allocation8]] }
 0x13b   :  { %1198 = vmatpush1.bf16.msra.mxu1 %v1627_v62  ;;  %v430_v62 = vld [vmem:[#allocation7 + $0x1a8] sm:$0xff] }
 0x13c   :  { %1199 = vmatprep.subr.bf16.mxu1 %v1636_v1  ;;  %v434_v1 = vld [vmem:[#allocation7 + $0x1c8] sm:$0xff] }
 0x13f   :  { %1200 = vmatpush1.bf16.msra.mxu1 %v1635_v2  ;;  %v438_v2 = vld [vmem:[#allocation7 + $0x1e8] sm:$0xff] }
 0x140   :  { %1201 = vmatprep.subr.bf16.mxu1 %v1644_v5  ;;  %v1654_v4 = vcombine.high %v434_v1, %v438_v2  ;;  %v442_v5 = vld [vmem:[#allocation7 + $0x208] sm:$0xff]  ;;  %v1653_v7 = vcombine.low %v434_v1, %v438_v2 }
 0x143   :  { %1202 = vmatpush1.bf16.msra.mxu1 %v1643_v6  ;;  %v446_v6 = vld [vmem:[#allocation7 + $0x228] sm:$0xff] }
 0x144   :  { %1203 = vmatprep.subr.bf16.mxu1 %v1652_v9  ;;  %v1662_v8 = vcombine.high %v442_v5, %v446_v6  ;;  %v450_v9 = vld [vmem:[#allocation7 + $0x248] sm:$0xff]  ;;  %v1661_v11 = vcombine.low %v442_v5, %v446_v6  ;;  %v387_v5 = vld [vmem:[#allocation7 + $0x50] sm:$0xff] }
 0x145   :  { %v391_v6 = vld [vmem:[#allocation7 + $0x70] sm:$0xff] }
 0x147   :  { %1204 = vmatpush1.bf16.msra.mxu1 %v1651_v10  ;;  %v454_v10 = vld [vmem:[#allocation7 + $0x268] sm:$0xff] }
 0x148   :  { %1205 = vmatprep.subr.bf16.mxu1 %v1660_v13  ;;  %v1670_v12 = vcombine.high %v450_v9, %v454_v10  ;;  %v458_v13 = vld [vmem:[#allocation7 + $0x288] sm:$0xff]  ;;  %v1669_v15 = vcombine.low %v450_v9, %v454_v10 }
 0x14b   :  { %1206 = vmatpush1.bf16.msra.mxu1 %v1659_v14  ;;  %v462_v14 = vld [vmem:[#allocation7 + $0x2a8] sm:$0xff] }
 0x14c   :  { %1207 = vmatprep.subr.bf16.mxu1 %v1668_v17  ;;  %v1678_v16 = vcombine.high %v458_v13, %v462_v14  ;;  %v466_v17 = vld [vmem:[#allocation7 + $0x2c8] sm:$0xff]  ;;  %v1677_v19 = vcombine.low %v458_v13, %v462_v14  ;;  %v399_v14 = vld [vmem:[#allocation7 + $0xb0] sm:$0xff] }
 0x14f   :  { %1208 = vmatpush1.bf16.msra.mxu1 %v1667_v18  ;;  %v470_v18 = vld [vmem:[#allocation7 + $0x2e8] sm:$0xff] }
 0x150   :  { %1209 = vmatprep.subr.bf16.mxu1 %v1676_v21  ;;  %v1686_v20 = vcombine.high %v466_v17, %v470_v18  ;;  %v474_v21 = vld [vmem:[#allocation7 + $0x308] sm:$0xff]  ;;  %v1685_v23 = vcombine.low %v466_v17, %v470_v18  ;;  %v1607_v17 = vcombine.low %v387_v5, %v391_v6 }
 0x153   :  { %1210 = vmatpush1.bf16.msra.mxu1 %v1675_v22  ;;  %v478_v22 = vld [vmem:[#allocation7 + $0x328] sm:$0xff] }
 0x154   :  { %1211 = vmatprep.subr.bf16.mxu1 %v1684_v25  ;;  %v1694_v24 = vcombine.high %v474_v21, %v478_v22  ;;  %v482_v25 = vld [vmem:[#allocation7 + $0x348] sm:$0xff]  ;;  %v1693_v27 = vcombine.low %v474_v21, %v478_v22  ;;  %v403_v21 = vld [vmem:[#allocation7 + $0xd0] sm:$0xff] }
 0x155   :  { %v407_v22 = vld [vmem:[#allocation7 + $0xf0] sm:$0xff] }
 0x157   :  { %1212 = vmatpush1.bf16.msra.mxu1 %v1683_v26  ;;  %v486_v26 = vld [vmem:[#allocation7 + $0x368] sm:$0xff] }
 0x158   :  { %1213 = vmatprep.subr.bf16.mxu1 %v1692_v29  ;;  %v1702_v28 = vcombine.high %v482_v25, %v486_v26  ;;  %v1701_v29 = vcombine.low %v482_v25, %v486_v26 }
 0x15b   :  { %1214 = vmatpush1.bf16.msra.mxu1 %v1691_v30  ;;  %v489_v30 = vld [vmem:[#allocation7 + $0x380] sm:$0xff] }
 0x15c   :  { %1215 = vmatprep.subr.bf16.mxu1 %v1700_v33  ;;  %v1708_v33 = vcombine.high %v489_v30, %v493_v31 }
 0x15f   :  { %1216 = vmatpush1.bf16.msra.mxu1 %v1699_v34  ;;  %v494_v34 = vld [vmem:[#allocation7 + $0x3a8] sm:$0xff] }
 0x160   :  { %v1710_v37 = vcombine.high %v490_v32, %v494_v34  ;;  %1217 = vmatprep.subr.bf16.mxu1 %v1708_v33  ;;  %v1623_v33 = vcombine.low %v403_v21, %v407_v22 }
 0x1fd   :  { %v219_v36 = vpop.f32.mrb[4].mxu1 }
 0x1fe   :  { %v220_v39 = vadd.f32 %v1575_v35, %v219_v36  ;;  %v1760_v40 = vpop.f32.mrb[5].mxu1  ;;  %v1707_v35 = vcombine.low %v489_v30, %v493_v31  ;;  %v1709_v36 = vcombine.low %v490_v32, %v494_v34  ;;  %v415_v30 = vld [vmem:[#allocation7 + $0x130] sm:$0xff]  ;;  %v412_v31 = vld [vmem:[#allocation7 + $0x118] sm:$0xff] }
 0x1ff   :  { %v222_v42 = vpop.f32.mrb[6].mxu1  ;;  %v498_v40 = vld [vmem:[#allocation7 + $0x3c8] sm:$0xff]  ;;  %v416_v32 = vld [vmem:[#allocation7 + $0x138] sm:$0xff] }
 0x200   :  { %v241_v43 = vpack.c.bf16 %v220_v39, %v220_v39  ;;  %v1761_v45 = vpop.f32.mrb[7].mxu1  ;;  %1218 = vmatpush1.bf16.msra.mxu1 %v1707_v35  ;;  %v501_v39 = vld [vmem:[#allocation7 + $0x3e0] sm:$0xff] }
 0x201   :  { %v1716_v42 = vcombine.high %v497_v38, %v501_v39  ;;  %v1715_v45 = vcombine.low %v497_v38, %v501_v39  ;;  %v423_v38 = vld [vmem:[#allocation7 + $0x170] sm:$0xff]  ;;  %v420_v39 = vld [vmem:[#allocation7 + $0x158] sm:$0xff] }
 0x202   :  { %367 = vmatmul.mubr.bf16.vlgmr.msra.gmra.mrb[0].mxu0 %v241_v43  ;;  %v502_v43 = vld [vmem:[#allocation7 + $0x3e8] sm:$0xff] }
 0x203   :  { %1231 = vmatpush1.bf16.msra.mxu0 %v1597_v47  ;;  %v426_v47 = vld [vmem:[#allocation7 + $0x188] sm:$0xff]  ;;  %v1718_v48 = vcombine.high %v498_v40, %v502_v43  ;;  %1219 = vmatprep.subr.bf16.mxu1 %v1716_v42 }
 0x204   :  { %1232 = vmatprep.subr.bf16.mxu0 %v1606_v46  ;;  %v1646_v0 = vcombine.high %v426_v47, %v430_v62  ;;  %v1645_v3 = vcombine.low %v426_v47, %v430_v62  ;;  %v1717_v46 = vcombine.low %v498_v40, %v502_v43  ;;  %1220 = vmatpush1.bf16.msra.mxu1 %v1715_v45  ;;  %v424_v40 = vld [vmem:[#allocation7 + $0x178] sm:$0xff] }
 0x205   :  { %v1633_v43 = vcombine.low %v412_v31, %v416_v32 }
 0x207   :  { %1233 = vmatpush1.bf16.msra.mxu0 %v1605_v50  ;;  %v383_v50 = vld [vmem:[#allocation7 + $0x30] sm:$0xff] }
 0x208   :  { %1234 = vmatprep.subr.bf16.mxu0 %v1614_v51  ;;  %v380_v51 = vld [vmem:[#allocation7 + $0x18] sm:$0xff]  ;;  %v1600_v52 = vcombine.high %v379_v49, %v383_v50 }
 0x209   :  { %v1602_v56 = vcombine.high %v380_v51, %v384_v53 }
 0x20a   :  { %1271 = vmatprep.subr.bf16.mxu1 %v1600_v52 }
 0x20b   :  { %1235 = vmatpush1.bf16.msra.mxu0 %v1613_v54  ;;  %v1599_v54 = vcombine.low %v379_v49, %v383_v50  ;;  %v431_v49 = vld [vmem:[#allocation7 + $0x1b0] sm:$0xff]  ;;  %v428_v50 = vld [vmem:[#allocation7 + $0x198] sm:$0xff] }
 0x20c   :  { %1236 = vmatprep.subr.bf16.mxu0 %v1622_v55  ;;  %v1601_v55 = vcombine.low %v380_v51, %v384_v53  ;;  %v432_v51 = vld [vmem:[#allocation7 + $0x1b8] sm:$0xff]  ;;  %v1641_v53 = vcombine.low %v420_v39, %v424_v40 }
 0x20f   :  { %1237 = vmatpush1.bf16.msra.mxu0 %v1621_v58  ;;  %v2046_v58 = vshrl.u32 %v244_v57, 7 }
 0x210   :  { %1238 = vmatprep.subr.bf16.mxu0 %v1630_v59 }
 0x211   :  { %v246_v59 = vsub.s32 0, %v2046_v58  ;;  %v250_v61 = vsub.s32 1, %v2046_v58 }
 0x213   :  { %1239 = vmatpush1.bf16.msra.mxu0 %v1629_v41  ;;  %v247_v41 = vrot.slane %v242_v60, %v246_v59 }
 0x214   :  { %1240 = vmatprep.subr.bf16.mxu0 %v1638_v44  ;;  %v251_v44 = vrot.slane %v242_v60, %v250_v61  ;;  %v439_v60 = vld [vmem:[#allocation7 + $0x1f0] sm:$0xff] }
 0x217   :  { %1241 = vmatpush1.bf16.msra.mxu0 %v1637_v63 }
 0x218   :  { %1242 = vmatprep.subr.bf16.mxu0 %v1646_v0 }
 0x21b   :  { %1243 = vmatpush1.bf16.msra.mxu0 %v1645_v3 }
 0x21c   :  { %1244 = vmatprep.subr.bf16.mxu0 %v1654_v4 }
 0x21f   :  { %1245 = vmatpush1.bf16.msra.mxu0 %v1653_v7  ;;  %v388_v7 = vld [vmem:[#allocation7 + $0x58] sm:$0xff] }
 0x220   :  { %1246 = vmatprep.subr.bf16.mxu0 %v1662_v8  ;;  %v392_v8 = vld [vmem:[#allocation7 + $0x78] sm:$0xff] }
 0x221   :  { %v1610_v13 = vcombine.high %v388_v7, %v392_v8  ;;  %v1609_v18 = vcombine.low %v388_v7, %v392_v8 }
 0x223   :  { %1247 = vmatpush1.bf16.msra.mxu0 %v1661_v11  ;;  %v395_v11 = vld [vmem:[#allocation7 + $0x90] sm:$0xff] }
 0x224   :  { %1248 = vmatprep.subr.bf16.mxu0 %v1670_v12  ;;  %v1608_v12 = vcombine.high %v387_v5, %v391_v6  ;;  %v1615_v25 = vcombine.low %v395_v11, %v399_v14 }
 0x227   :  { %1249 = vmatpush1.bf16.msra.mxu0 %v1669_v15  ;;  %v396_v15 = vld [vmem:[#allocation7 + $0x98] sm:$0xff] }
 0x228   :  { %1250 = vmatprep.subr.bf16.mxu0 %v1678_v16  ;;  %v400_v16 = vld [vmem:[#allocation7 + $0xb8] sm:$0xff] }
 0x229   :  { %v1617_v26 = vcombine.low %v396_v15, %v400_v16 }
 0x22b   :  { %1251 = vmatpush1.bf16.msra.mxu0 %v1677_v19  ;;  %v1616_v19 = vcombine.high %v395_v11, %v399_v14  ;;  %v455_v11 = vld [vmem:[#allocation7 + $0x270] sm:$0xff] }
 0x22c   :  { %1252 = vmatprep.subr.bf16.mxu0 %v1686_v20  ;;  %v1618_v20 = vcombine.high %v396_v15, %v400_v16 }
 0x22f   :  { %1253 = vmatpush1.bf16.msra.mxu0 %v1685_v23  ;;  %v404_v23 = vld [vmem:[#allocation7 + $0xd8] sm:$0xff] }
 0x230   :  { %1254 = vmatprep.subr.bf16.mxu0 %v1694_v24  ;;  %v408_v24 = vld [vmem:[#allocation7 + $0xf8] sm:$0xff] }
 0x231   :  { %v1625_v34 = vcombine.low %v404_v23, %v408_v24 }
 0x233   :  { %1255 = vmatpush1.bf16.msra.mxu0 %v1693_v27  ;;  %v1624_v27 = vcombine.high %v403_v21, %v407_v22  ;;  %v464_v21 = vld [vmem:[#allocation7 + $0x2b8] sm:$0xff] }
 0x234   :  { %1256 = vmatprep.subr.bf16.mxu0 %v1702_v28  ;;  %v1626_v28 = vcombine.high %v404_v23, %v408_v24 }
 0x237   :  { %1257 = vmatpush1.bf16.msra.mxu0 %v1701_v29  ;;  %v411_v29 = vld [vmem:[#allocation7 + $0x110] sm:$0xff] }
 0x238   :  { %1258 = vmatprep.subr.bf16.mxu0 %v1710_v37  ;;  %v1632_v35 = vcombine.high %v411_v29, %v415_v30  ;;  %v419_v37 = vld [vmem:[#allocation7 + $0x150] sm:$0xff]  ;;  %v1631_v42 = vcombine.low %v411_v29, %v415_v30  ;;  %v472_v29 = vld [vmem:[#allocation7 + $0x2f8] sm:$0xff] }
 0x239   :  { %v1640_v45 = vcombine.high %v419_v37, %v423_v38  ;;  %v1639_v52 = vcombine.low %v419_v37, %v423_v38  ;;  %v480_v37 = vld [vmem:[#allocation7 + $0x338] sm:$0xff] }
 0x23b   :  { %1259 = vmatpush1.bf16.msra.mxu0 %v1709_v36  ;;  %v1634_v36 = vcombine.high %v412_v31, %v416_v32 }
 0x23c   :  { %1260 = vmatprep.subr.bf16.mxu0 %v1718_v48  ;;  %v427_v48 = vld [vmem:[#allocation7 + $0x190] sm:$0xff] }
 0x23f   :  { %1261 = vmatpush1.bf16.msra.mxu0 %v1717_v46  ;;  %v1642_v46 = vcombine.high %v420_v39, %v424_v40 }
 0x240   :  { %1312 = vmatprep.subr.bf16.mxu0 %v1602_v56  ;;  %v435_v56 = vld [vmem:[#allocation7 + $0x1d0] sm:$0xff] }
 0x241   :  { %v1655_v5 = vcombine.low %v435_v56, %v439_v60 }
 0x2d5   :  { %v368_v47 = vpop.f32.mrb[0].mxu0 }
 0x2d6   :  { %v369_v62 = vadd.f32 %v368_v47, %v247_v41  ;;  %v370_v63 = vpop.f32.mrb[1].mxu0  ;;  %v436_v41 = vld [vmem:[#allocation7 + $0x1d8] sm:$0xff]  ;;  %v1647_v47 = vcombine.low %v427_v48, %v431_v49 }
 0x2d7   :  { %v371_v0 = vadd.f32 %v370_v63, %v251_v44  ;;  %v372_v1 = vpop.f32.mrb[2].mxu0  ;;  %v440_v44 = vld [vmem:[#allocation7 + $0x1f8] sm:$0xff]  ;;  %v1656_v63 = vcombine.high %v435_v56, %v439_v60 }
 0x2d8   :  { %v375_v2 = vmax.f32 %v369_v62, 0.0  ;;  %v373_v3 = vpop.f32.mrb[3].mxu0  ;;  %v1649_v62 = vcombine.low %v428_v50, %v432_v51  ;;  %v443_v1 = vld [vmem:[#allocation7 + $0x210] sm:$0xff]  ;;  %v1657_v6 = vcombine.low %v436_v41, %v440_v44  ;;  %v496_v56 = vld [vmem:[#allocation7 + $0x3b8] sm:$0xff] }
 0x2d9   :  { %v376_v4 = vmax.f32 %v371_v0, 0.0  ;;  %v1658_v0 = vcombine.high %v436_v41, %v440_v44  ;;  %v444_v3 = vld [vmem:[#allocation7 + $0x218] sm:$0xff] }
 0x2da   :  { %v2057_v10 = vpack.c.bf16 %v375_v2, %v375_v2  ;;  %v447_v2 = vld [vmem:[#allocation7 + $0x230] sm:$0xff] }
 0x2db   :  { %v506_v9 = vpack.c.bf16 %v376_v4, %v376_v4  ;;  %v448_v4 = vld [vmem:[#allocation7 + $0x238] sm:$0xff]  ;;  %v1664_v7 = vcombine.high %v443_v1, %v447_v2  ;;  %v1663_v14 = vcombine.low %v443_v1, %v447_v2 }
 0x2dc   :  { %v1666_v8 = vcombine.high %v444_v3, %v448_v4  ;;  %v1665_v15 = vcombine.low %v444_v3, %v448_v4  ;;  %v504_v1 = vld [vmem:[#allocation7 + $0x3f8] sm:$0xff] }
 0x2dd   :  { %1221 = vmatprep.mubr.bf16.mxu1 %v506_v9  ;;  %1262 = vmatprep.mubr.bf16.mxu0 %v506_v9 }
 0x2de   :  { %1222 = vmatmul.mubr.bf16.vlgmr.msra.gmra.mrb[8].mxu1 %v2057_v10  ;;  %1263 = vmatmul.mubr.bf16.vlgmr.msra.gmra.mrb[4].mxu0 %v2057_v10 }
 0x2df   :  { %1272 = vmatpush1.bf16.msra.mxu1 %v1599_v54  ;;  %1313 = vmatpush1.bf16.msra.mxu0 %v1601_v55  ;;  %v1648_v54 = vcombine.high %v427_v48, %v431_v49  ;;  %v1650_v55 = vcombine.high %v428_v50, %v432_v51  ;;  %v488_v48 = vld [vmem:[#allocation7 + $0x378] sm:$0xff] }
 0x2e0   :  { %1303 = vmatprep.mubr.bf16.mxu1 %v506_v9  ;;  %1344 = vmatprep.mubr.bf16.mxu0 %v506_v9  ;;  %v451_v9 = vld [vmem:[#allocation7 + $0x250] sm:$0xff] }
 0x2e1   :  { %1273 = vmatprep.subr.bf16.mxu1 %v1608_v12  ;;  %1314 = vmatprep.subr.bf16.mxu0 %v1610_v13  ;;  %v452_v12 = vld [vmem:[#allocation7 + $0x258] sm:$0xff]  ;;  %v1672_v16 = vcombine.high %v451_v9, %v455_v11  ;;  %v1671_v22 = vcombine.low %v451_v9, %v455_v11 }
 0x2e2   :  { %v456_v13 = vld [vmem:[#allocation7 + $0x278] sm:$0xff] }
 0x2e3   :  { %1274 = vmatpush1.bf16.msra.mxu1 %v1607_v17  ;;  %1315 = vmatpush1.bf16.msra.mxu0 %v1609_v18  ;;  %v1674_v17 = vcombine.high %v452_v12, %v456_v13  ;;  %v459_v18 = vld [vmem:[#allocation7 + $0x290] sm:$0xff]  ;;  %v1673_v23 = vcombine.low %v452_v12, %v456_v13  ;;  %v2071_v9 = vld [vmem:[%s2175_s8] sm:$0xff]  ;;  %s2096_s8 = sld [smem:[#allocation8 + $0x100]] }
 0x2e4   :  { %1275 = vmatprep.subr.bf16.mxu1 %v1616_v19  ;;  %1316 = vmatprep.subr.bf16.mxu0 %v1618_v20  ;;  %v463_v19 = vld [vmem:[#allocation7 + $0x2b0] sm:$0xff]  ;;  %v460_v20 = vld [vmem:[#allocation7 + $0x298] sm:$0xff]  ;;  %v512_v11 = vrot.slane %v2071_v9, %v246_v59  ;;  %v516_v13 = vrot.slane %v2071_v9, %v250_v61  ;;  %v1366_v59 = vstv %s2075_s27 }
 0x2e5   :  { %v1680_v24 = vcombine.high %v459_v18, %v463_v19  ;;  %v1679_v30 = vcombine.low %v459_v18, %v463_v19  ;;  %v1681_v31 = vcombine.low %v460_v20, %v464_v21  ;;  %v1362_v18 = vstv %s2063_s7 }
 0x2e6   :  { %v1433_v19 = vstv %s2065_s23 }
 0x2e7   :  { %1276 = vmatpush1.bf16.msra.mxu1 %v1615_v25  ;;  %1317 = vmatpush1.bf16.msra.mxu0 %v1617_v26  ;;  %v1682_v25 = vcombine.high %v460_v20, %v464_v21  ;;  %v467_v26 = vld [vmem:[#allocation7 + $0x2d0] sm:$0xff] }
 0x2e8   :  { %1277 = vmatprep.subr.bf16.mxu1 %v1624_v27  ;;  %1318 = vmatprep.subr.bf16.mxu0 %v1626_v28  ;;  %v471_v27 = vld [vmem:[#allocation7 + $0x2f0] sm:$0xff]  ;;  %v468_v28 = vld [vmem:[#allocation7 + $0x2d8] sm:$0xff] }
 0x2e9   :  { %v1688_v32 = vcombine.high %v467_v26, %v471_v27  ;;  %v1687_v38 = vcombine.low %v467_v26, %v471_v27  ;;  %v1689_v39 = vcombine.low %v468_v28, %v472_v29 }
 0x2eb   :  { %1278 = vmatpush1.bf16.msra.mxu1 %v1623_v33  ;;  %1319 = vmatpush1.bf16.msra.mxu0 %v1625_v34  ;;  %v1690_v33 = vcombine.high %v468_v28, %v472_v29  ;;  %v475_v34 = vld [vmem:[#allocation7 + $0x310] sm:$0xff]  ;;  %v1437_v29 = vstv %s2078_s29 }
 0x2ec   :  { %1279 = vmatprep.subr.bf16.mxu1 %v1632_v35  ;;  %1320 = vmatprep.subr.bf16.mxu0 %v1634_v36  ;;  %v479_v35 = vld [vmem:[#allocation7 + $0x330] sm:$0xff]  ;;  %v476_v36 = vld [vmem:[#allocation7 + $0x318] sm:$0xff] }
 0x2ed   :  { %v1696_v40 = vcombine.high %v475_v34, %v479_v35  ;;  %v1695_v49 = vcombine.low %v475_v34, %v479_v35  ;;  %v1697_v50 = vcombine.low %v476_v36, %v480_v37 }
 0x2ef   :  { %1280 = vmatpush1.bf16.msra.mxu1 %v1631_v42  ;;  %1321 = vmatpush1.bf16.msra.mxu0 %v1633_v43  ;;  %v1698_v42 = vcombine.high %v476_v36, %v480_v37  ;;  %v483_v43 = vld [vmem:[#allocation7 + $0x350] sm:$0xff] }
 0x2f0   :  { %1281 = vmatprep.subr.bf16.mxu1 %v1640_v45  ;;  %1322 = vmatprep.subr.bf16.mxu0 %v1642_v46  ;;  %v487_v45 = vld [vmem:[#allocation7 + $0x370] sm:$0xff]  ;;  %v484_v46 = vld [vmem:[#allocation7 + $0x358] sm:$0xff] }
 0x2f1   :  { %v1704_v51 = vcombine.high %v483_v43, %v487_v45  ;;  %v1703_v60 = vcombine.low %v483_v43, %v487_v45  ;;  %v1705_v41 = vcombine.low %v484_v46, %v488_v48 }
 0x2f3   :  { %1282 = vmatpush1.bf16.msra.mxu1 %v1639_v52  ;;  %1323 = vmatpush1.bf16.msra.mxu0 %v1641_v53  ;;  %v1706_v52 = vcombine.high %v484_v46, %v488_v48  ;;  %v491_v53 = vld [vmem:[#allocation7 + $0x390] sm:$0xff] }
 0x2f4   :  { %1283 = vmatprep.subr.bf16.mxu1 %v1648_v54  ;;  %1324 = vmatprep.subr.bf16.mxu0 %v1650_v55  ;;  %v495_v54 = vld [vmem:[#allocation7 + $0x3b0] sm:$0xff]  ;;  %v492_v55 = vld [vmem:[#allocation7 + $0x398] sm:$0xff] }
 0x2f5   :  { %v1712_v44 = vcombine.high %v491_v53, %v495_v54  ;;  %v1711_v2 = vcombine.low %v491_v53, %v495_v54  ;;  %v1713_v3 = vcombine.low %v492_v55, %v496_v56 }
 0x2f7   :  { %1284 = vmatpush1.bf16.msra.mxu1 %v1647_v47  ;;  %1325 = vmatpush1.bf16.msra.mxu0 %v1649_v62  ;;  %v1714_v47 = vcombine.high %v492_v55, %v496_v56  ;;  %v499_v62 = vld [vmem:[#allocation7 + $0x3d0] sm:$0xff]  ;;  %v527_v56 = vsub.s32 4, %v2046_v58 }
 0x2f8   :  { %1285 = vmatprep.subr.bf16.mxu1 %v1656_v63  ;;  %1326 = vmatprep.subr.bf16.mxu0 %v1658_v0  ;;  %v503_v63 = vld [vmem:[#allocation7 + $0x3f0] sm:$0xff]  ;;  %v500_v0 = vld [vmem:[#allocation7 + $0x3d8] sm:$0xff] }
 0x2f9   :  { %v1720_v4 = vcombine.high %v499_v62, %v503_v63 }
 0x2fb   :  { %1286 = vmatpush1.bf16.msra.mxu1 %v1655_v5  ;;  %1327 = vmatpush1.bf16.msra.mxu0 %v1657_v6  ;;  %v1722_v5 = vcombine.high %v500_v0, %v504_v1  ;;  %v1719_v6 = vcombine.low %v499_v62, %v503_v63 }
 0x2fc   :  { %1287 = vmatprep.subr.bf16.mxu1 %v1664_v7  ;;  %1328 = vmatprep.subr.bf16.mxu0 %v1666_v8  ;;  %v1721_v7 = vcombine.low %v500_v0, %v504_v1  ;;  %v519_v8 = vsub.s32 2, %v2046_v58 }
 0x2fe   :  { %v520_v12 = vrot.slane %v2071_v9, %v519_v8 }
 0x2ff   :  { %1288 = vmatpush1.bf16.msra.mxu1 %v1663_v14  ;;  %1329 = vmatpush1.bf16.msra.mxu0 %v1665_v15 }
 0x300   :  { %1289 = vmatprep.subr.bf16.mxu1 %v1672_v16  ;;  %1330 = vmatprep.subr.bf16.mxu0 %v1674_v17 }
 0x303   :  { %1290 = vmatpush1.bf16.msra.mxu1 %v1671_v22  ;;  %1331 = vmatpush1.bf16.msra.mxu0 %v1673_v23  ;;  %v1500_v23 = vstv %s2073_s26 }
 0x304   :  { %1291 = vmatprep.subr.bf16.mxu1 %v1680_v24  ;;  %1332 = vmatprep.subr.bf16.mxu0 %v1682_v25 }
 0x307   :  { %1292 = vmatpush1.bf16.msra.mxu1 %v1679_v30  ;;  %1333 = vmatpush1.bf16.msra.mxu0 %v1681_v31  ;;  %v1504_v30 = vstv %s2080_s11 }
 0x308   :  { %1293 = vmatprep.subr.bf16.mxu1 %v1688_v32  ;;  %1334 = vmatprep.subr.bf16.mxu0 %v1690_v33 }
 0x30b   :  { %1294 = vmatpush1.bf16.msra.mxu1 %v1687_v38  ;;  %1335 = vmatpush1.bf16.msra.mxu0 %v1689_v39 }
 0x30c   :  { %1295 = vmatprep.subr.bf16.mxu1 %v1696_v40  ;;  %1336 = vmatprep.subr.bf16.mxu0 %v1698_v42 }
 0x30f   :  { %1296 = vmatpush1.bf16.msra.mxu1 %v1695_v49  ;;  %1337 = vmatpush1.bf16.msra.mxu0 %v1697_v50 }
 0x310   :  { %1297 = vmatprep.subr.bf16.mxu1 %v1704_v51  ;;  %1338 = vmatprep.subr.bf16.mxu0 %v1706_v52 }
 0x313   :  { %1298 = vmatpush1.bf16.msra.mxu1 %v1703_v60  ;;  %1339 = vmatpush1.bf16.msra.mxu0 %v1705_v41  ;;  %v535_v60 = vsub.s32 6, %v2046_v58  ;;  %v531_v41 = vsub.s32 5, %v2046_v58 }
 0x314   :  { %1299 = vmatprep.subr.bf16.mxu1 %v1712_v44  ;;  %1340 = vmatprep.subr.bf16.mxu0 %v1714_v47  ;;  %v539_v44 = vsub.s32 7, %v2046_v58  ;;  %v528_v47 = vrot.slane %v2071_v9, %v527_v56 }
 0x315   :  { %v536_v62 = vrot.slane %v2071_v9, %v535_v60  ;;  %v532_v63 = vrot.slane %v2071_v9, %v531_v41 }
 0x316   :  { %v540_v0 = vrot.slane %v2071_v9, %v539_v44 }
 0x317   :  { %1300 = vmatpush1.bf16.msra.mxu1 %v1711_v2  ;;  %1341 = vmatpush1.bf16.msra.mxu0 %v1713_v3  ;;  %v1372_v2 = vstv %s2096_s8 }
 0x318   :  { %1301 = vmatprep.subr.bf16.mxu1 %v1720_v4  ;;  %1342 = vmatprep.subr.bf16.mxu0 %v1722_v5  ;;  %v1443_v5 = vstv %s2099_s1 }
 0x31b   :  { %1302 = vmatpush1.bf16.msra.mxu1 %v1719_v6  ;;  %1343 = vmatpush1.bf16.msra.mxu0 %v1721_v7  ;;  %v1510_v6 = vstv %s2101_s9 }
 0x31e   :  { %1304 = vmatmul.mubr.bf16.vlgmr.msra.gmra.mrb[12].mxu1 %v2057_v10  ;;  %1345 = vmatmul.mubr.bf16.vlgmr.msra.gmra.mrb[8].mxu0 %v2057_v10  ;;  %v523_v10 = vsub.s32 3, %v2046_v58 }
 0x320   :  { %v524_v14 = vrot.slane %v2071_v9, %v523_v10 }
 0x3b1   :  { %v1223_v15 = vpop.f32.mrb[8].mxu1  ;;  %v1264_v16 = vpop.f32.mrb[4].mxu0 }
 0x3b2   :  { %v1224_v17 = vadd.f32 %v1223_v15, %v512_v11  ;;  %v1265_v20 = vadd.f32 %v1264_v16, %v520_v12  ;;  %v1225_v21 = vpop.f32.mrb[9].mxu1  ;;  %v1266_v22 = vpop.f32.mrb[5].mxu0  ;;  %v1378_v11 = vstv %s2104_s28  ;;  %v1449_v12 = vstv %s2106_s12 }
 0x3b3   :  { %v1226_v24 = vadd.f32 %v1225_v21, %v516_v13  ;;  %v1267_v25 = vadd.f32 %v1266_v22, %v524_v14  ;;  %v1227_v26 = vpop.f32.mrb[10].mxu1  ;;  %v1268_v27 = vpop.f32.mrb[6].mxu0  ;;  %v1455_v22 = vstv %s2114_s16 }
 0x3b4   :  { %v1353_v28 = vmax.f32 %v1224_v17, 0.0  ;;  %v1355_v61 = vmax.f32 %v1265_v20, 0.0  ;;  %v1228_v31 = vpop.f32.mrb[11].mxu1  ;;  %v1269_v32 = vpop.f32.mrb[7].mxu0 }
 0x3b5   :  { %v1354_v33 = vmax.f32 %v1226_v24, 0.0  ;;  %v1356_v34 = vmax.f32 %v1267_v25, 0.0 }
 0x3b6   :  { %v1363_v35 = vmul.f32 %v1362_v18, %v1353_v28  ;;  %v1434_v36 = vmul.f32 %v1433_v19, %v1353_v28  ;;  %v1501_v37 = vmul.f32 %v1500_v23, %v1353_v28  ;;  %v1367_v38 = vmul.f32 %v1366_v59, %v1355_v61 }
 0x3b7   :  { %v1438_v39 = vmul.f32 %v1437_v29, %v1355_v61  ;;  %v1505_v40 = vmul.f32 %v1504_v30, %v1355_v61  ;;  %v1364_v42 = vmul.f32 %v1362_v18, %v1354_v33  ;;  %v1435_v43 = vmul.f32 %v1433_v19, %v1354_v33 }
 0x3b8   :  { %v1369_v45 = vadd.f32 %v1367_v38, %v1363_v35  ;;  %v1502_v46 = vmul.f32 %v1500_v23, %v1354_v33  ;;  %v1368_v48 = vmul.f32 %v1366_v59, %v1356_v34  ;;  %v1439_v49 = vmul.f32 %v1437_v29, %v1356_v34 }
 0x3b9   :  { %v1440_v50 = vadd.f32 %v1438_v39, %v1434_v36  ;;  %v1507_v51 = vadd.f32 %v1505_v40, %v1501_v37  ;;  %v1506_v52 = vmul.f32 %v1504_v30, %v1356_v34  ;;  %v1384_v18 = vstv %s2110_s13 }
 0x3ba   :  { %v1370_v53 = vadd.f32 %v1368_v48, %v1364_v42  ;;  %v1441_v54 = vadd.f32 %v1439_v49, %v1435_v43  ;;  %v1516_v19 = vstv %s2112_s15  ;;  %v1522_v23 = vstv %s2116_s4 }
 0x3bb   :  { %v1508_v55 = vadd.f32 %v1506_v52, %v1502_v46 }
 0x3f1   :  { %v1305_v1 = vpop.f32.mrb[12].mxu1  ;;  %v1346_v3 = vpop.f32.mrb[8].mxu0 }
 0x3f2   :  { %v1306_v4 = vadd.f32 %v1305_v1, %v528_v47  ;;  %v1347_v7 = vadd.f32 %v1346_v3, %v536_v62  ;;  %v1307_v8 = vpop.f32.mrb[13].mxu1  ;;  %v1348_v10 = vpop.f32.mrb[9].mxu0 }
 0x3f3   :  { %v1308_v13 = vadd.f32 %v1307_v8, %v532_v63  ;;  %v1349_v14 = vadd.f32 %v1348_v10, %v540_v0  ;;  %v1309_v15 = vpop.f32.mrb[14].mxu1  ;;  %v1350_v16 = vpop.f32.mrb[10].mxu0 }
 0x3f4   :  { %v1357_v9 = vmax.f32 %v1306_v4, 0.0  ;;  %v1359_v17 = vmax.f32 %v1347_v7, 0.0  ;;  %v1310_v20 = vpop.f32.mrb[15].mxu1  ;;  %v1351_v21 = vpop.f32.mrb[11].mxu0 }
 0x3f5   :  { %v1358_v59 = vmax.f32 %v1308_v13, 0.0  ;;  %v1360_v24 = vmax.f32 %v1349_v14, 0.0  ;;  %v1919_v13 = vmov 1966171168  }
 0x3f6   :  { %v1373_v25 = vmul.f32 %v1372_v2, %v1357_v9  ;;  %v1444_v26 = vmul.f32 %v1443_v5, %v1357_v9  ;;  %v1511_v27 = vmul.f32 %v1510_v6, %v1357_v9  ;;  %v1379_v28 = vmul.f32 %v1378_v11, %v1359_v17 }
 0x3f7   :  { %v1450_v61 = vmul.f32 %v1449_v12, %v1359_v17  ;;  %v1517_v29 = vmul.f32 %v1516_v19, %v1359_v17  ;;  %v1374_v30 = vmul.f32 %v1372_v2, %v1358_v59  ;;  %v1445_v31 = vmul.f32 %v1443_v5, %v1358_v59 }
 0x3f8   :  { %v1375_v32 = vadd.f32 %v1373_v25, %v1369_v45  ;;  %v1446_v33 = vadd.f32 %v1444_v26, %v1440_v50  ;;  %v1513_v34 = vadd.f32 %v1511_v27, %v1507_v51  ;;  %v1512_v35 = vmul.f32 %v1510_v6, %v1358_v59 }
 0x3f9   :  { %v1376_v36 = vadd.f32 %v1374_v30, %v1370_v53  ;;  %v1447_v37 = vadd.f32 %v1445_v31, %v1441_v54  ;;  %v1380_v38 = vmul.f32 %v1378_v11, %v1360_v24  ;;  %v1451_v39 = vmul.f32 %v1449_v12, %v1360_v24 }
 0x3fa   :  { %v1381_v40 = vadd.f32 %v1379_v28, %v1375_v32  ;;  %v1452_v42 = vadd.f32 %v1450_v61, %v1446_v33  ;;  %v1519_v43 = vadd.f32 %v1517_v29, %v1513_v34  ;;  %v1514_v46 = vadd.f32 %v1512_v35, %v1508_v55 }
 0x3fb   :  { %v1382_v48 = vadd.f32 %v1380_v38, %v1376_v36  ;;  %v1453_v49 = vadd.f32 %v1451_v39, %v1447_v37  ;;  %v1518_v52 = vmul.f32 %v1516_v19, %v1360_v24  ;;  %v1403_v14 = vunpack.c.l.s4 %v1919_v13 }
 0x3fc   :  { %v1385_v56 = vadd.f32 %v1384_v18, %v1381_v40  ;;  %v1456_v60 = vadd.f32 %v1455_v22, %v1452_v42  ;;  %v1523_v41 = vadd.f32 %v1522_v23, %v1519_v43 }
 0x3fd   :  { %v1386_v44 = vadd.f32 %v1384_v18, %v1382_v48  ;;  %v1457_v47 = vadd.f32 %v1455_v22, %v1453_v49  ;;  %v1520_v45 = vadd.f32 %v1518_v52, %v1514_v46  ;;  %v1404_v15 = vunpack.c.0.s8 %v1403_v14 }
 0x3fe   :  { %v1727_v50 = vmul.f32 -1.442695, %v1385_v56  ;;  %v1734_v51 = vmul.f32 -1.442695, %v1456_v60  ;;  %v1741_v62 = vmul.f32 -1.442695, %v1523_v41 }
 0x3ff   :  { %v1728_v53 = vmul.f32 -1.442695, %v1386_v44  ;;  %v1524_v54 = vadd.f32 %v1522_v23, %v1520_v45  ;;  %v1735_v63 = vmul.f32 -1.442695, %v1457_v47  ;;  %v1407_v18 = vsub.s32 %v1404_v15, %v2046_v58 }
 0x400   :  { %1800 = vpow2.f32 %v1727_v50 }
 0x401   :  { %1802 = vpow2.f32 %v1734_v51  ;;  %v1742_v0 = vmul.f32 -1.442695, %v1524_v54 }
 0x402   :  { %1804 = vpow2.f32 %v1741_v62 }
 0x403   :  { %1806 = vpow2.f32 %v1728_v53 }
 0x404   :  { %1808 = vpow2.f32 %v1735_v63 }
 0x405   :  { %1810 = vpow2.f32 %v1742_v0 }
 0x40a   :  { %v1801_v55 = vpop.eup %1800 }
 0x40b   :  { %v1803_v1 = vpop.eup %1802  ;;  %v1393_v2 = vadd.f32 1.0, %v1801_v55 }
 0x40c   :  { %v1805_v3 = vpop.eup %1804  ;;  %v1464_v4 = vadd.f32 1.0, %v1803_v1 }
 0x40d   :  { %v1807_v5 = vpop.eup %1806  ;;  %1812 = vrcp.f32 %v1393_v2  ;;  %v1531_v6 = vadd.f32 1.0, %v1805_v3 }
 0x40e   :  { %v1809_v7 = vpop.eup %1808  ;;  %1814 = vrcp.f32 %v1464_v4  ;;  %v1394_v8 = vadd.f32 1.0, %v1807_v5 }
 0x40f   :  { %v1811_v10 = vpop.eup %1810  ;;  %1816 = vrcp.f32 %v1531_v6  ;;  %v1465_v11 = vadd.f32 1.0, %v1809_v7 }
 0x410   :  { %1818 = vrcp.f32 %v1394_v8  ;;  %v1532_v12 = vadd.f32 1.0, %v1811_v10 }
 0x411   :  { %1820 = vrcp.f32 %v1465_v11 }
 0x412   :  { %1822 = vrcp.f32 %v1532_v12 }
 0x417   :  { %v1813_v16 = vpop.eup %1812 }
 0x418   :  { %v1815_v9 = vpop.eup %1814 }
 0x419   :  { %v1817_v17 = vpop.eup %1816 }
 0x41a   :  { %v1819_v19 = vpop.eup %1818 }
 0x41b   :  { %v1821_v20 = vpop.eup %1820  ;;  %v1401_v21 = vcombine.low %v1813_v16, %v1819_v19 }
 0x41c   :  { %v1823_v22 = vpop.eup %1822  ;;  %v1472_v23 = vcombine.low %v1815_v9, %v1821_v20 }
 0x41d   :  { %v1408_v59 = vrot.slane %v1401_v21, %v1407_v18  ;;  %v1539_v24 = vcombine.low %v1817_v17, %v1823_v22 }
 0x41e   :  { %v1479_v26 = vrot.slane %v1472_v23, %v1407_v18 }
 0x41f   :  { %v1409_v27 = vcombine.high %v1408_v59, %v1408_v59  ;;  %v1416_v28 = vrot.slane %v1408_v59, %v1407_v18  ;;  %v1546_v61 = vrot.slane %v1539_v24, %v1407_v18 }
 0x420   :  { %v1480_v29 = vcombine.high %v1479_v26, %v1479_v26  ;;  %v1487_v30 = vrot.slane %v1479_v26, %v1407_v18 }
 0x421   :  { %v1423_v31 = vrot.slane %v1409_v27, %v1407_v18  ;;  %1430 = vst.msk [vmem:[%s2177_s10] sm:$0x3] %vm2133_vm5, %v1416_v28  ;;  %v1547_v58 = vcombine.high %v1546_v61, %v1546_v61  ;;  %v1554_v32 = vrot.slane %v1546_v61, %v1407_v18 }
 0x422   :  { %v1494_v33 = vrot.slane %v1480_v29, %v1407_v18  ;;  %1497 = vst.msk [vmem:[%s2177_s10 + $0x2] sm:$0x3] %vm2133_vm5, %v1487_v30 }
 0x423   :  { %1431 = vst.msk [vmem:[%s2177_s10 + $0x6] sm:$0x3] %vm2133_vm5, %v1423_v31  ;;  %v1561_v57 = vrot.slane %v1547_v58, %v1407_v18  ;;  %1564 = vst.msk [vmem:[%s2177_s10 + $0x4] sm:$0x3] %vm2133_vm5, %v1554_v32 }
 0x424   :  { %1498 = vst.msk [vmem:[%s2177_s10 + $0x8] sm:$0x3] %vm2133_vm5, %v1494_v33 }
 0x425   :  { %1565 = vst.msk [vmem:[%s2177_s10 + $0xa] sm:$0x3] %vm2133_vm5, %v1561_v57 }
 0x426   :  { %1570 = vsyncpa [#allocation3], 1 }
 0x427   :  { %1571 = vsyncpa [#allocation6], 1 }
 0x428   :  { %1572 = vsyncpa [#allocation4], 1 }

</bundles_post_ra>
